<compile_context>
chip_gen: v5e
topology: v5e:2x2
jax: 0.10.0
libtpu: 0.0.40
codegen_flags: <defaults>
</compile_context>

<pallas_src>
import functools

import jax
import jax.numpy as jnp
from jax.experimental import pallas as pl
from jax.experimental.pallas import tpu as pltpu

GROWTH = 32          # DenseNet growth rate / channel count of both convs' outputs
EPS = 1e-5
VMEM_LIMIT = 48 * 1024 * 1024   # explicit scoped-VMEM cap (safe on v5e/v6e/v7x)


# --------------------------------------------------------------------------- #
# Kernels
# --------------------------------------------------------------------------- #
def _conv1_kernel(x_ref, w1_ref, y_ref, st_ref):
    """1x1 conv as a channel matmul + BN1 statistics accumulated across tiles.

    x_ref : (1, Cin, ts)  input tile (NCHW, spatial flattened, lane-dense, zero-padded)
    w1_ref: (32, Cin) bf16 conv1 weight
    y_ref : (1, 32, ts) bf16 conv1 output tile
    st_ref: (1, 32, 2) f32  per-image [sum, sum_sq] per channel (accumulated over t)
    """
    xb = x_ref[0].astype(jnp.bfloat16)                                    # (Cin, ts)
    y = jnp.dot(w1_ref[...], xb, preferred_element_type=jnp.float32)      # (32, ts) f32
    y_ref[0] = y.astype(y_ref.dtype)                                      # bf16 store

    stats = jnp.concatenate(
        [jnp.sum(y, axis=1, keepdims=True),
         jnp.sum(y * y, axis=1, keepdims=True)], axis=1)                  # (32, 2)

    t = pl.program_id(1)

    @pl.when(t == 0)
    def _():
        st_ref[0] = stats

    @pl.when(t != 0)
    def _():
        st_ref[0] += stats


def _conv2_kernel(y_ref, s1_ref, b1_ref, w2_ref, z_ref, st_ref, *, W, HW, HWp):
    """Fused BN1+ReLU -> 3x3 conv (padding=1) as 3 accumulating K=96 matmuls -> BN2 stats.

    y_ref : (1, 32, HWp) bf16  conv1 output (one image, spatial zero-padded to HWp)
    s1/b1 : (32, 1)      f32   folded BN1 scale / shift
    w2_ref: (3, 32, 96)  bf16  conv2 weight, [kh, o, kw*32 + ci]
    z_ref : (1, 32, HWp) bf16  conv2 output (pre-BN2)
    st_ref: (1, 32, 2)   f32   per-image [sum, sum_sq] per channel of z
    """
    C = GROWTH

    # BN1 (folded affine) + ReLU in f32, then mask the padded tail back to zero
    # (padded y is 0 -> a would be max(shift,0) there and corrupt bottom-edge taps).
    a = jnp.maximum(y_ref[0].astype(jnp.float32) * s1_ref[...] + b1_ref[...], 0.0)
    pos = jax.lax.broadcasted_iota(jnp.int32, (1, HWp), 1)
    valid = pos < HW
    a = jnp.where(valid, a, 0.0)                                          # (32, HWp)
    ab = a.astype(jnp.bfloat16)

    # Zero-extend the flat spatial axis by W+1 on each side: row over/underflow of a
    # 3x3 tap lands in the zero strips (or the zeroed pad tail); only the column wrap
    # needs masks.
    pad = W + 1
    zstrip = jnp.zeros((C, pad), jnp.bfloat16)
    apad = jnp.concatenate([zstrip, ab, zstrip], axis=1)                  # (32, HWp+2W+2)

    ww = pos % W
    mask_l = ww >= 1            # valid positions for a left-neighbor tap  (ox = -1)
    mask_r = ww <= W - 2        # valid positions for a right-neighbor tap (ox = +1)

    z = jnp.zeros((C, HWp), jnp.float32)
    for r, oy in enumerate((-1, 0, 1)):            # one K=96 matmul per row offset
        taps = []
        for ox in (-1, 0, 1):
            s = oy * W + ox
            t = apad[:, pad + s: pad + s + HWp]                           # (32, HWp)
            if ox == -1:
                t = jnp.where(mask_l, t, jnp.zeros_like(t))
            elif ox == 1:
                t = jnp.where(mask_r, t, jnp.zeros_like(t))
            taps.append(t)
        grp = jnp.concatenate(taps, axis=0)                               # (96, HWp) bf16
        z = z + jnp.dot(w2_ref[r], grp, preferred_element_type=jnp.float32)

    z = jnp.where(valid, z, 0.0)                 # padded tail -> 0 (keeps stats exact)
    z_ref[0] = z.astype(z_ref.dtype)             # bf16 store
    st_ref[0] = jnp.concatenate(
        [jnp.sum(z, axis=1, keepdims=True),
         jnp.sum(z * z, axis=1, keepdims=True)], axis=1)                  # (32, 2)


def _bn_relu_kernel(z_ref, s_ref, b_ref, o_ref):
    """Elementwise BN2 (folded affine) + ReLU, lane-dense; bf16 in, f32 out."""
    o_ref[0] = jnp.maximum(z_ref[0].astype(jnp.float32) * s_ref[...] + b_ref[...], 0.0)


# --------------------------------------------------------------------------- #
# Wrapper
# --------------------------------------------------------------------------- #
def _pad_and_tile(hw, cap=1024):
    """Pad H*W up to a multiple of 128; pick the largest lane-aligned tile <= cap
    that divides the padded extent."""
    hw_pad = ((hw + 127) // 128) * 128
    ts = 128
    for cand in range(min(hw_pad, cap), 0, -128):
        if hw_pad % cand == 0:
            ts = cand
            break
    return hw_pad, ts


@jax.jit
def dense_layer_forward(x_nchw, params):
    """x_nchw: (N, Cin, H, W) f32 -> (N, 32, H, W) f32 (training-mode BatchNorm)."""
    N, Cin, H, W = x_nchw.shape
    C = GROWTH
    HW = H * W
    HWp, ts = _pad_and_tile(HW)
    S = HWp // ts
    cnt = float(N * HW)                              # true element count (no padding)

    x = x_nchw.reshape(N, Cin, HW)                   # view, no transpose
    if HWp != HW:
        x = jnp.pad(x, ((0, 0), (0, 0), (0, HWp - HW)))   # zero pad -> stats unaffected

    # Weights: OIHW -> matmul form, bf16 MXU operands.
    w1 = params["w1"].reshape(C, Cin).astype(jnp.bfloat16)                 # (32, Cin)
    # (O,I,KH,KW) -> (KH, O, KW, I) -> (3, 32, 96); group kh, column = kw*32 + ci
    w2 = jnp.transpose(params["w2"], (2, 0, 3, 1)).reshape(3, C, 3 * C)
    w2 = w2.astype(jnp.bfloat16)

    # ---- pass 1: conv1x1 + BN1 statistics (accumulated over spatial tiles) ----
    y, st1 = pl.pallas_call(
        _conv1_kernel,
        grid=(N, S),
        in_specs=[
            pl.BlockSpec((1, Cin, ts), lambda n, t: (n, 0, t)),
            pl.BlockSpec((C, Cin), lambda n, t: (0, 0)),
        ],
        out_specs=[
            pl.BlockSpec((1, C, ts), lambda n, t: (n, 0, t)),
            pl.BlockSpec((1, C, 2), lambda n, t: (n, 0, 0)),   # resident across t
        ],
        out_shape=[
            jax.ShapeDtypeStruct((N, C, HWp), jnp.bfloat16),
            jax.ShapeDtypeStruct((N, C, 2), jnp.float32),
        ],
        compiler_params=pltpu.CompilerParams(
            dimension_semantics=("parallel", "arbitrary"),
            vmem_limit_bytes=VMEM_LIMIT),
    )(x, w1)

    tot1 = jnp.sum(st1, axis=0)                      # (32, 2)
    mean1 = tot1[:, 0] / cnt
    var1 = jnp.maximum(tot1[:, 1] / cnt - mean1 * mean1, 0.0)   # biased, clamped
    inv1 = jax.lax.rsqrt(var1 + EPS)
    scale1 = (params["g1"] * inv1).reshape(C, 1)
    shift1 = (params["b1"] - mean1 * params["g1"] * inv1).reshape(C, 1)

    # ---- pass 2: BN1+ReLU -> conv3x3 (3 accumulating K=96 matmuls) -> BN2 stats ----
    z, st2 = pl.pallas_call(
        functools.partial(_conv2_kernel, W=W, HW=HW, HWp=HWp),
        grid=(N,),
        in_specs=[
            pl.BlockSpec((1, C, HWp), lambda n: (n, 0, 0)),
            pl.BlockSpec((C, 1), lambda n: (0, 0)),
            pl.BlockSpec((C, 1), lambda n: (0, 0)),
            pl.BlockSpec((3, C, 3 * C), lambda n: (0, 0, 0)),
        ],
        out_specs=[
            pl.BlockSpec((1, C, HWp), lambda n: (n, 0, 0)),
            pl.BlockSpec((1, C, 2), lambda n: (n, 0, 0)),
        ],
        out_shape=[
            jax.ShapeDtypeStruct((N, C, HWp), jnp.bfloat16),
            jax.ShapeDtypeStruct((N, C, 2), jnp.float32),
        ],
        compiler_params=pltpu.CompilerParams(
            dimension_semantics=("parallel",),
            vmem_limit_bytes=VMEM_LIMIT),
    )(y, scale1, shift1, w2)

    tot2 = jnp.sum(st2, axis=0)                      # (32, 2)
    mean2 = tot2[:, 0] / cnt
    var2 = jnp.maximum(tot2[:, 1] / cnt - mean2 * mean2, 0.0)
    inv2 = jax.lax.rsqrt(var2 + EPS)
    scale2 = (params["g2"] * inv2).reshape(C, 1)
    shift2 = (params["b2"] - mean2 * params["g2"] * inv2).reshape(C, 1)

    # ---- pass 3: BN2 + ReLU (lane-dense elementwise) ---------------------------
    out = pl.pallas_call(
        _bn_relu_kernel,
        grid=(N, S),
        in_specs=[
            pl.BlockSpec((1, C, ts), lambda n, t: (n, 0, t)),
            pl.BlockSpec((C, 1), lambda n, t: (0, 0)),
            pl.BlockSpec((C, 1), lambda n, t: (0, 0)),
        ],
        out_specs=pl.BlockSpec((1, C, ts), lambda n, t: (n, 0, t)),
        out_shape=jax.ShapeDtypeStruct((N, C, HWp), jnp.float32),
        compiler_params=pltpu.CompilerParams(
            dimension_semantics=("parallel", "parallel"),
            vmem_limit_bytes=VMEM_LIMIT),
    )(z, scale2, shift2)

    if HWp != HW:
        out = out[:, :, :HW]
    return out.reshape(N, C, H, W)                   # already NCHW, view reshape


# --------------------------------------------------------------------------- #
# Pure-JAX reference (matches PyTorch training-mode forward) + test harness
# --------------------------------------------------------------------------- #
def reference_forward(x_nchw, params):
    def bn_relu(v, g, b):
        mu = jnp.mean(v, axis=(0, 2, 3), keepdims=True)
        var = jnp.mean((v - mu) ** 2, axis=(0, 2, 3), keepdims=True)
        v = (v - mu) / jnp.sqrt(var + EPS) * g.reshape(1, -1, 1, 1) + b.reshape(1, -1, 1, 1)
        return jnp.maximum(v, 0.0)

    dn = ("NCHW", "OIHW", "NCHW")
    v = jax.lax.conv_general_dilated(x_nchw, params["w1"], (1, 1), "VALID",
                                     dimension_numbers=dn)
    v = bn_relu(v, params["g1"], params["b1"])
    v = jax.lax.conv_general_dilated(v, params["w2"], (1, 1), "SAME",
                                     dimension_numbers=dn)
    v = bn_relu(v, params["g2"], params["b2"])
    return v


def init_params(key, in_channels):
    ks = jax.random.split(key, 6)
    return {
        "w1": jax.random.normal(ks[0], (GROWTH, in_channels, 1, 1), jnp.float32) * 0.1,
        "w2": jax.random.normal(ks[1], (GROWTH, GROWTH, 3, 3), jnp.float32) * 0.05,
        "g1": 1.0 + 0.1 * jax.random.normal(ks[2], (GROWTH,), jnp.float32),
        "b1": 0.1 * jax.random.normal(ks[3], (GROWTH,), jnp.float32),
        "g2": 1.0 + 0.1 * jax.random.normal(ks[4], (GROWTH,), jnp.float32),
        "b2": 0.1 * jax.random.normal(ks[5], (GROWTH,), jnp.float32),
    }


if __name__ == "__main__":
    key = jax.random.PRNGKey(0)
    k_x, k_p = jax.random.split(key)

    N, Cin, H, W = 2, 4, 16, 16
    x = jax.random.normal(k_x, (N, Cin, H, W), jnp.float32)
    params = init_params(k_p, Cin)

    out = jax.block_until_ready(dense_layer_forward(x, params))
    ref = reference_forward(x, params)

    assert out.shape == (N, GROWTH, H, W), out.shape
    max_err = float(jnp.max(jnp.abs(out - ref)))
    # bf16 MXU operands + bf16 intermediate storage (f32 accumulation / elementwise
    # / statistics) -> tolerance 5e-2.
    assert jnp.allclose(out, ref, atol=5e-2, rtol=5e-2), max_err

    print("KERNEL_OK")
</pallas_src>

<mosaic_0001>
module attributes {stable_mosaic.version = 11 : i64} {
  func.func @_conv1_kernel(%arg0: i32, %arg1: i32, %arg2: memref<1x4x256xf32, #tpu.memory_space<vmem>>, %arg3: memref<32x4xbf16, #tpu.memory_space<vmem>>, %arg4: memref<1x32x256xbf16, #tpu.memory_space<vmem>>, %arg5: memref<1x32x2xf32, #tpu.memory_space<vmem>>) attributes {dimension_semantics = [#tpu.dimension_semantics<parallel>, #tpu.dimension_semantics<arbitrary>], iteration_bounds = array<i64: 2, 1>, scalar_prefetch = 0 : i64, scratch_operands = 0 : i64, tpu.core_type = #tpu.core_type<tc>, window_params = [{transform_indices = @transform_0, window_bounds = array<i64: 1, 4, 256>}, {pipeline_mode = #tpu.pipeline_mode<synchronous>, transform_indices = @transform_1, window_bounds = array<i64: 32, 4>}, {transform_indices = @transform_2, window_bounds = array<i64: 1, 32, 256>}, {transform_indices = @transform_3, window_bounds = array<i64: 1, 32, 2>}]} {
    %c0 = arith.constant 0 : index
    %c0_0 = arith.constant 0 : index
    %c0_1 = arith.constant 0 : index
    %0 = vector.load %arg2[%c0, %c0_0, %c0_1] : memref<1x4x256xf32, #tpu.memory_space<vmem>>, vector<1x4x256xf32>
    %1 = vector.shape_cast %0 : vector<1x4x256xf32> to vector<4x256xf32>
    %2 = arith.truncf %1 : vector<4x256xf32> to vector<4x256xbf16>
    %c0_2 = arith.constant 0 : index
    %c0_3 = arith.constant 0 : index
    %3 = vector.load %arg3[%c0_2, %c0_3] : memref<32x4xbf16, #tpu.memory_space<vmem>>, vector<32x4xbf16>
    %cst = arith.constant dense<0.000000e+00> : vector<32x256xf32>
    %4 = tpu.matmul %3, %2, %cst {dimension_numbers = #tpu.dot_dimension_numbers<[1], [0], [0], [1], [0, 0, 1, 1], [], []>} : vector<32x4xbf16>, vector<4x256xbf16>, vector<32x256xf32> -> vector<32x256xf32>
    %5 = arith.truncf %4 : vector<32x256xf32> to vector<32x256xbf16>
    %c0_4 = arith.constant 0 : index
    %c0_5 = arith.constant 0 : index
    %c0_6 = arith.constant 0 : index
    %6 = vector.load %arg4[%c0_4, %c0_5, %c0_6] : memref<1x32x256xbf16, #tpu.memory_space<vmem>>, vector<1x32x256xbf16>
    %7 = vector.shape_cast %6 : vector<1x32x256xbf16> to vector<32x256xbf16>
    %8 = vector.shape_cast %5 : vector<32x256xbf16> to vector<1x32x256xbf16>
    tpu.vector_store %arg4[%c0_4, %c0_5, %c0_6], %8 {strides = array<i32>} : memref<1x32x256xbf16, #tpu.memory_space<vmem>>, vector<1x32x256xbf16>,
    %cst_7 = arith.constant dense<0.000000e+00> : vector<32xf32>
    %9 = vector.multi_reduction <add>, %4, %cst_7 [1] : vector<32x256xf32> to vector<32xf32>
    %10 = vector.shape_cast %9 : vector<32xf32> to vector<32x1xf32>
    %11 = arith.mulf %4, %4 : vector<32x256xf32>
    %cst_8 = arith.constant dense<0.000000e+00> : vector<32xf32>
    %12 = vector.multi_reduction <add>, %11, %cst_8 [1] : vector<32x256xf32> to vector<32xf32>
    %13 = vector.shape_cast %12 : vector<32xf32> to vector<32x1xf32>
    %14 = tpu.concatenate %10, %13 in 1 : vector<32x1xf32>, vector<32x1xf32> -> vector<32x2xf32>
    %c0_i32 = arith.constant 0 : i32
    %15 = arith.cmpi eq, %arg1, %c0_i32 : i32
    %16 = arith.extui %15 : i1 to i32
    %c0_i32_9 = arith.constant 0 : i32
    %17 = arith.cmpi ne, %16, %c0_i32_9 : i32
    scf.if %17 {
      %c0_12 = arith.constant 0 : index
      %c0_13 = arith.constant 0 : index
      %c0_14 = arith.constant 0 : index
      %21 = vector.load %arg5[%c0_12, %c0_13, %c0_14] : memref<1x32x2xf32, #tpu.memory_space<vmem>>, vector<1x32x2xf32>
      %22 = vector.shape_cast %21 : vector<1x32x2xf32> to vector<32x2xf32>
      %23 = vector.shape_cast %14 : vector<32x2xf32> to vector<1x32x2xf32>
      tpu.vector_store %arg5[%c0_12, %c0_13, %c0_14], %23 {strides = array<i32>} : memref<1x32x2xf32, #tpu.memory_space<vmem>>, vector<1x32x2xf32>,
    } else {
    }
    %c0_i32_10 = arith.constant 0 : i32
    %18 = arith.cmpi ne, %arg1, %c0_i32_10 : i32
    %19 = arith.extui %18 : i1 to i32
    %c0_i32_11 = arith.constant 0 : i32
    %20 = arith.cmpi ne, %19, %c0_i32_11 : i32
    scf.if %20 {
      %c0_12 = arith.constant 0 : index
      %c0_13 = arith.constant 0 : index
      %c0_14 = arith.constant 0 : index
      %21 = vector.load %arg5[%c0_12, %c0_13, %c0_14] : memref<1x32x2xf32, #tpu.memory_space<vmem>>, vector<1x32x2xf32>
      %22 = vector.shape_cast %21 : vector<1x32x2xf32> to vector<32x2xf32>
      %23 = arith.addf %22, %14 : vector<32x2xf32>
      %c0_15 = arith.constant 0 : index
      %c0_16 = arith.constant 0 : index
      %c0_17 = arith.constant 0 : index
      %24 = vector.load %arg5[%c0_15, %c0_16, %c0_17] : memref<1x32x2xf32, #tpu.memory_space<vmem>>, vector<1x32x2xf32>
      %25 = vector.shape_cast %24 : vector<1x32x2xf32> to vector<32x2xf32>
      %26 = vector.shape_cast %23 : vector<32x2xf32> to vector<1x32x2xf32>
      tpu.vector_store %arg5[%c0_15, %c0_16, %c0_17], %26 {strides = array<i32>} : memref<1x32x2xf32, #tpu.memory_space<vmem>>, vector<1x32x2xf32>,
    } else {
    }
    return
  }
  func.func @transform_0(%arg0: i32, %arg1: i32) -> (i32, i32, i32) {
    %c0_i32 = arith.constant 0 : i32
    %c0_i32_0 = arith.constant 0 : i32
    return %arg0, %c0_i32, %arg1 : i32, i32, i32
  }
  func.func @transform_1(%arg0: i32, %arg1: i32) -> (i32, i32) {
    %c0_i32 = arith.constant 0 : i32
    %c0_i32_0 = arith.constant 0 : i32
    %c0_i32_1 = arith.constant 0 : i32
    return %c0_i32, %c0_i32_0 : i32, i32
  }
  func.func @transform_2(%arg0: i32, %arg1: i32) -> (i32, i32, i32) {
    %c0_i32 = arith.constant 0 : i32
    %c0_i32_0 = arith.constant 0 : i32
    return %arg0, %c0_i32, %arg1 : i32, i32, i32
  }
  func.func @transform_3(%arg0: i32, %arg1: i32) -> (i32, i32, i32) {
    %c0_i32 = arith.constant 0 : i32
    %c0_i32_0 = arith.constant 0 : i32
    %c0_i32_1 = arith.constant 0 : i32
    return %arg0, %c0_i32, %c0_i32_0 : i32, i32, i32
  }
}

module attributes {stable_mosaic.version = 11 : i64} {
  func.func @_conv2_kernel(%arg0: i32, %arg1: memref<1x32x256xbf16, #tpu.memory_space<vmem>>, %arg2: memref<32x1xf32, #tpu.memory_space<vmem>>, %arg3: memref<32x1xf32, #tpu.memory_space<vmem>>, %arg4: memref<3x32x96xbf16, #tpu.memory_space<vmem>>, %arg5: memref<1x32x256xbf16, #tpu.memory_space<vmem>>, %arg6: memref<1x32x2xf32, #tpu.memory_space<vmem>>) attributes {dimension_semantics = [#tpu.dimension_semantics<parallel>], iteration_bounds = array<i64: 2>, scalar_prefetch = 0 : i64, scratch_operands = 0 : i64, tpu.core_type = #tpu.core_type<tc>, window_params = [{transform_indices = @transform_0, window_bounds = array<i64: 1, 32, 256>}, {pipeline_mode = #tpu.pipeline_mode<synchronous>, transform_indices = @transform_1, window_bounds = array<i64: 32, 1>}, {pipeline_mode = #tpu.pipeline_mode<synchronous>, transform_indices = @transform_2, window_bounds = array<i64: 32, 1>}, {pipeline_mode = #tpu.pipeline_mode<synchronous>, transform_indices = @transform_3, window_bounds = array<i64: 3, 32, 96>}, {transform_indices = @transform_4, window_bounds = array<i64: 1, 32, 256>}, {transform_indices = @transform_5, window_bounds = array<i64: 1, 32, 2>}]} {
    %c0 = arith.constant 0 : index
    %c0_0 = arith.constant 0 : index
    %c0_1 = arith.constant 0 : index
    %0 = vector.load %arg1[%c0, %c0_0, %c0_1] : memref<1x32x256xbf16, #tpu.memory_space<vmem>>, vector<1x32x256xbf16>
    %1 = vector.shape_cast %0 : vector<1x32x256xbf16> to vector<32x256xbf16>
    %2 = arith.extf %1 : vector<32x256xbf16> to vector<32x256xf32>
    %c0_2 = arith.constant 0 : index
    %c0_3 = arith.constant 0 : index
    %3 = vector.load %arg2[%c0_2, %c0_3] : memref<32x1xf32, #tpu.memory_space<vmem>>, vector<32x1xf32>
    %4 = vector.broadcast %3 : vector<32x1xf32> to vector<32x256xf32>
    %5 = arith.mulf %2, %4 : vector<32x256xf32>
    %c0_4 = arith.constant 0 : index
    %c0_5 = arith.constant 0 : index
    %6 = vector.load %arg3[%c0_4, %c0_5] : memref<32x1xf32, #tpu.memory_space<vmem>>, vector<32x1xf32>
    %7 = vector.broadcast %6 : vector<32x1xf32> to vector<32x256xf32>
    %8 = arith.addf %5, %7 : vector<32x256xf32>
    %cst = arith.constant 0.000000e+00 : f32
    %9 = vector.broadcast %cst : f32 to vector<32x256xf32>
    %10 = arith.maximumf %8, %9 : vector<32x256xf32>
    %11 = tpu.iota {dimensions = array<i32: 1>} : vector<1x256xi32>
    %c256_i32 = arith.constant 256 : i32
    %12 = vector.broadcast %c256_i32 : i32 to vector<1x256xi32>
    %13 = arith.cmpi slt, %11, %12 : vector<1x256xi32>
    %cst_6 = arith.constant 0.000000e+00 : f32
    %14 = vector.shape_cast %13 : vector<1x256xi1> to vector<1x256xi1>
    %15 = vector.broadcast %14 : vector<1x256xi1> to vector<32x256xi1>
    %16 = vector.broadcast %cst_6 : f32 to vector<32x256xf32>
    %17 = arith.select %15, %10, %16 : vector<32x256xi1>, vector<32x256xf32>
    %18 = arith.truncf %17 : vector<32x256xf32> to vector<32x256xbf16>
    %cst_7 = arith.constant 0.000000e+00 : bf16
    %19 = vector.broadcast %cst_7 : bf16 to vector<32x17xbf16>
    %20 = tpu.concatenate %19, %18, %19 in 1 : vector<32x17xbf16>, vector<32x256xbf16>, vector<32x17xbf16> -> vector<32x290xbf16>
    %c16_i32 = arith.constant 16 : i32
    %c0_i32 = arith.constant 0 : i32
    %21 = arith.cmpi eq, %c16_i32, %c0_i32 : i32
    %c1_i32 = arith.constant 1 : i32
    %22 = arith.select %21, %c1_i32, %c16_i32 : i32
    %23 = vector.broadcast %22 : i32 to vector<1x256xi32>
    %24 = arith.remsi %11, %23 : vector<1x256xi32>
    %c0_i32_8 = arith.constant 0 : i32
    %25 = vector.broadcast %c0_i32_8 : i32 to vector<1x256xi32>
    %26 = arith.cmpi ne, %24, %25 : vector<1x256xi32>
    %c0_i32_9 = arith.constant 0 : i32
    %27 = vector.broadcast %c0_i32_9 : i32 to vector<1x256xi32>
    %28 = arith.cmpi slt, %24, %27 : vector<1x256xi32>
    %c0_i32_10 = arith.constant 0 : i32
    %29 = arith.cmpi slt, %22, %c0_i32_10 : i32
    %30 = vector.broadcast %29 : i1 to vector<1x256xi1>
    %31 = vector.broadcast %30 : vector<1x256xi1> to vector<1x256xi1>
    %32 = arith.xori %28, %31 : vector<1x256xi1>
    %33 = arith.andi %32, %26 : vector<1x256xi1>
    %34 = vector.broadcast %22 : i32 to vector<1x256xi32>
    %35 = arith.addi %24, %34 : vector<1x256xi32>
    %36 = arith.select %33, %35, %24 : vector<1x256xi1>, vector<1x256xi32>
    %c1_i32_11 = arith.constant 1 : i32
    %37 = vector.broadcast %c1_i32_11 : i32 to vector<1x256xi32>
    %38 = arith.cmpi sge, %36, %37 : vector<1x256xi32>
    %c14_i32 = arith.constant 14 : i32
    %39 = vector.broadcast %c14_i32 : i32 to vector<1x256xi32>
    %40 = arith.cmpi sle, %36, %39 : vector<1x256xi32>
    %cst_12 = arith.constant 0.000000e+00 : f32
    %41 = vector.broadcast %cst_12 : f32 to vector<32x256xf32>
    %42 = vector.extract_strided_slice %20 {offsets = [0, 0], sizes = [32, 256], strides = [1, 1]} : vector<32x290xbf16> to vector<32x256xbf16>
    %cst_13 = arith.constant 0.000000e+00 : bf16
    %43 = vector.broadcast %cst_13 : bf16 to vector<32x256xbf16>
    %44 = vector.shape_cast %38 : vector<1x256xi1> to vector<1x256xi1>
    %45 = vector.broadcast %44 : vector<1x256xi1> to vector<32x256xi1>
    %46 = arith.select %45, %42, %43 : vector<32x256xi1>, vector<32x256xbf16>
    %47 = vector.extract_strided_slice %20 {offsets = [0, 1], sizes = [32, 256], strides = [1, 1]} : vector<32x290xbf16> to vector<32x256xbf16>
    %48 = vector.extract_strided_slice %20 {offsets = [0, 2], sizes = [32, 256], strides = [1, 1]} : vector<32x290xbf16> to vector<32x256xbf16>
    %cst_14 = arith.constant 0.000000e+00 : bf16
    %49 = vector.broadcast %cst_14 : bf16 to vector<32x256xbf16>
    %50 = vector.shape_cast %40 : vector<1x256xi1> to vector<1x256xi1>
    %51 = vector.broadcast %50 : vector<1x256xi1> to vector<32x256xi1>
    %52 = arith.select %51, %48, %49 : vector<32x256xi1>, vector<32x256xbf16>
    %53 = tpu.concatenate %46, %47, %52 in 0 : vector<32x256xbf16>, vector<32x256xbf16>, vector<32x256xbf16> -> vector<96x256xbf16>
    %c0_15 = arith.constant 0 : index
    %c0_16 = arith.constant 0 : index
    %c0_17 = arith.constant 0 : index
    %54 = vector.load %arg4[%c0_15, %c0_16, %c0_17] : memref<3x32x96xbf16, #tpu.memory_space<vmem>>, vector<1x32x96xbf16>
    %55 = vector.shape_cast %54 : vector<1x32x96xbf16> to vector<32x96xbf16>
    %cst_18 = arith.constant dense<0.000000e+00> : vector<32x256xf32>
    %56 = tpu.matmul %55, %53, %cst_18 {dimension_numbers = #tpu.dot_dimension_numbers<[1], [0], [0], [1], [0, 0, 1, 1], [], []>} : vector<32x96xbf16>, vector<96x256xbf16>, vector<32x256xf32> -> vector<32x256xf32>
    %57 = arith.addf %41, %56 : vector<32x256xf32>
    %58 = vector.extract_strided_slice %20 {offsets = [0, 16], sizes = [32, 256], strides = [1, 1]} : vector<32x290xbf16> to vector<32x256xbf16>
    %cst_19 = arith.constant 0.000000e+00 : bf16
    %59 = vector.broadcast %cst_19 : bf16 to vector<32x256xbf16>
    %60 = vector.shape_cast %38 : vector<1x256xi1> to vector<1x256xi1>
    %61 = vector.broadcast %60 : vector<1x256xi1> to vector<32x256xi1>
    %62 = arith.select %61, %58, %59 : vector<32x256xi1>, vector<32x256xbf16>
    %63 = vector.extract_strided_slice %20 {offsets = [0, 17], sizes = [32, 256], strides = [1, 1]} : vector<32x290xbf16> to vector<32x256xbf16>
    %64 = vector.extract_strided_slice %20 {offsets = [0, 18], sizes = [32, 256], strides = [1, 1]} : vector<32x290xbf16> to vector<32x256xbf16>
    %cst_20 = arith.constant 0.000000e+00 : bf16
    %65 = vector.broadcast %cst_20 : bf16 to vector<32x256xbf16>
    %66 = vector.shape_cast %40 : vector<1x256xi1> to vector<1x256xi1>
    %67 = vector.broadcast %66 : vector<1x256xi1> to vector<32x256xi1>
    %68 = arith.select %67, %64, %65 : vector<32x256xi1>, vector<32x256xbf16>
    %69 = tpu.concatenate %62, %63, %68 in 0 : vector<32x256xbf16>, vector<32x256xbf16>, vector<32x256xbf16> -> vector<96x256xbf16>
    %c1 = arith.constant 1 : index
    %c0_21 = arith.constant 0 : index
    %c0_22 = arith.constant 0 : index
    %70 = vector.load %arg4[%c1, %c0_21, %c0_22] : memref<3x32x96xbf16, #tpu.memory_space<vmem>>, vector<1x32x96xbf16>
    %71 = vector.shape_cast %70 : vector<1x32x96xbf16> to vector<32x96xbf16>
    %cst_23 = arith.constant dense<0.000000e+00> : vector<32x256xf32>
    %72 = tpu.matmul %71, %69, %cst_23 {dimension_numbers = #tpu.dot_dimension_numbers<[1], [0], [0], [1], [0, 0, 1, 1], [], []>} : vector<32x96xbf16>, vector<96x256xbf16>, vector<32x256xf32> -> vector<32x256xf32>
    %73 = arith.addf %57, %72 : vector<32x256xf32>
    %74 = vector.extract_strided_slice %20 {offsets = [0, 32], sizes = [32, 256], strides = [1, 1]} : vector<32x290xbf16> to vector<32x256xbf16>
    %cst_24 = arith.constant 0.000000e+00 : bf16
    %75 = vector.broadcast %cst_24 : bf16 to vector<32x256xbf16>
    %76 = vector.shape_cast %38 : vector<1x256xi1> to vector<1x256xi1>
    %77 = vector.broadcast %76 : vector<1x256xi1> to vector<32x256xi1>
    %78 = arith.select %77, %74, %75 : vector<32x256xi1>, vector<32x256xbf16>
    %79 = vector.extract_strided_slice %20 {offsets = [0, 33], sizes = [32, 256], strides = [1, 1]} : vector<32x290xbf16> to vector<32x256xbf16>
    %80 = vector.extract_strided_slice %20 {offsets = [0, 34], sizes = [32, 256], strides = [1, 1]} : vector<32x290xbf16> to vector<32x256xbf16>
    %cst_25 = arith.constant 0.000000e+00 : bf16
    %81 = vector.broadcast %cst_25 : bf16 to vector<32x256xbf16>
    %82 = vector.shape_cast %40 : vector<1x256xi1> to vector<1x256xi1>
    %83 = vector.broadcast %82 : vector<1x256xi1> to vector<32x256xi1>
    %84 = arith.select %83, %80, %81 : vector<32x256xi1>, vector<32x256xbf16>
    %85 = tpu.concatenate %78, %79, %84 in 0 : vector<32x256xbf16>, vector<32x256xbf16>, vector<32x256xbf16> -> vector<96x256xbf16>
    %c2 = arith.constant 2 : index
    %c0_26 = arith.constant 0 : index
    %c0_27 = arith.constant 0 : index
    %86 = vector.load %arg4[%c2, %c0_26, %c0_27] : memref<3x32x96xbf16, #tpu.memory_space<vmem>>, vector<1x32x96xbf16>
    %87 = vector.shape_cast %86 : vector<1x32x96xbf16> to vector<32x96xbf16>
    %cst_28 = arith.constant dense<0.000000e+00> : vector<32x256xf32>
    %88 = tpu.matmul %87, %85, %cst_28 {dimension_numbers = #tpu.dot_dimension_numbers<[1], [0], [0], [1], [0, 0, 1, 1], [], []>} : vector<32x96xbf16>, vector<96x256xbf16>, vector<32x256xf32> -> vector<32x256xf32>
    %89 = arith.addf %73, %88 : vector<32x256xf32>
    %cst_29 = arith.constant 0.000000e+00 : f32
    %90 = vector.shape_cast %13 : vector<1x256xi1> to vector<1x256xi1>
    %91 = vector.broadcast %90 : vector<1x256xi1> to vector<32x256xi1>
    %92 = vector.broadcast %cst_29 : f32 to vector<32x256xf32>
    %93 = arith.select %91, %89, %92 : vector<32x256xi1>, vector<32x256xf32>
    %94 = arith.truncf %93 : vector<32x256xf32> to vector<32x256xbf16>
    %c0_30 = arith.constant 0 : index
    %c0_31 = arith.constant 0 : index
    %c0_32 = arith.constant 0 : index
    %95 = vector.load %arg5[%c0_30, %c0_31, %c0_32] : memref<1x32x256xbf16, #tpu.memory_space<vmem>>, vector<1x32x256xbf16>
    %96 = vector.shape_cast %95 : vector<1x32x256xbf16> to vector<32x256xbf16>
    %97 = vector.shape_cast %94 : vector<32x256xbf16> to vector<1x32x256xbf16>
    tpu.vector_store %arg5[%c0_30, %c0_31, %c0_32], %97 {strides = array<i32>} : memref<1x32x256xbf16, #tpu.memory_space<vmem>>, vector<1x32x256xbf16>,
    %cst_33 = arith.constant dense<0.000000e+00> : vector<32xf32>
    %98 = vector.multi_reduction <add>, %93, %cst_33 [1] : vector<32x256xf32> to vector<32xf32>
    %99 = vector.shape_cast %98 : vector<32xf32> to vector<32x1xf32>
    %100 = arith.mulf %93, %93 : vector<32x256xf32>
    %cst_34 = arith.constant dense<0.000000e+00> : vector<32xf32>
    %101 = vector.multi_reduction <add>, %100, %cst_34 [1] : vector<32x256xf32> to vector<32xf32>
    %102 = vector.shape_cast %101 : vector<32xf32> to vector<32x1xf32>
    %103 = tpu.concatenate %99, %102 in 1 : vector<32x1xf32>, vector<32x1xf32> -> vector<32x2xf32>
    %c0_35 = arith.constant 0 : index
    %c0_36 = arith.constant 0 : index
    %c0_37 = arith.constant 0 : index
    %104 = vector.load %arg6[%c0_35, %c0_36, %c0_37] : memref<1x32x2xf32, #tpu.memory_space<vmem>>, vector<1x32x2xf32>
    %105 = vector.shape_cast %104 : vector<1x32x2xf32> to vector<32x2xf32>
    %106 = vector.shape_cast %103 : vector<32x2xf32> to vector<1x32x2xf32>
    tpu.vector_store %arg6[%c0_35, %c0_36, %c0_37], %106 {strides = array<i32>} : memref<1x32x2xf32, #tpu.memory_space<vmem>>, vector<1x32x2xf32>,
    return
  }
  func.func @transform_0(%arg0: i32) -> (i32, i32, i32) {
    %c0_i32 = arith.constant 0 : i32
    %c0_i32_0 = arith.constant 0 : i32
    %c0_i32_1 = arith.constant 0 : i32
    return %arg0, %c0_i32, %c0_i32_0 : i32, i32, i32
  }
  func.func @transform_1(%arg0: i32) -> (i32, i32) {
    %c0_i32 = arith.constant 0 : i32
    %c0_i32_0 = arith.constant 0 : i32
    %c0_i32_1 = arith.constant 0 : i32
    return %c0_i32, %c0_i32_0 : i32, i32
  }
  func.func @transform_2(%arg0: i32) -> (i32, i32) {
    %c0_i32 = arith.constant 0 : i32
    %c0_i32_0 = arith.constant 0 : i32
    %c0_i32_1 = arith.constant 0 : i32
    return %c0_i32, %c0_i32_0 : i32, i32
  }
  func.func @transform_3(%arg0: i32) -> (i32, i32, i32) {
    %c0_i32 = arith.constant 0 : i32
    %c0_i32_0 = arith.constant 0 : i32
    %c0_i32_1 = arith.constant 0 : i32
    %c0_i32_2 = arith.constant 0 : i32
    return %c0_i32, %c0_i32_0, %c0_i32_1 : i32, i32, i32
  }
  func.func @transform_4(%arg0: i32) -> (i32, i32, i32) {
    %c0_i32 = arith.constant 0 : i32
    %c0_i32_0 = arith.constant 0 : i32
    %c0_i32_1 = arith.constant 0 : i32
    return %arg0, %c0_i32, %c0_i32_0 : i32, i32, i32
  }
  func.func @transform_5(%arg0: i32) -> (i32, i32, i32) {
    %c0_i32 = arith.constant 0 : i32
    %c0_i32_0 = arith.constant 0 : i32
    %c0_i32_1 = arith.constant 0 : i32
    return %arg0, %c0_i32, %c0_i32_0 : i32, i32, i32
  }
}

module attributes {stable_mosaic.version = 11 : i64} {
  func.func @_bn_relu_kernel(%arg0: i32, %arg1: i32, %arg2: memref<1x32x256xbf16, #tpu.memory_space<vmem>>, %arg3: memref<32x1xf32, #tpu.memory_space<vmem>>, %arg4: memref<32x1xf32, #tpu.memory_space<vmem>>, %arg5: memref<1x32x256xf32, #tpu.memory_space<vmem>>) attributes {dimension_semantics = [#tpu.dimension_semantics<parallel>, #tpu.dimension_semantics<parallel>], iteration_bounds = array<i64: 2, 1>, scalar_prefetch = 0 : i64, scratch_operands = 0 : i64, tpu.core_type = #tpu.core_type<tc>, window_params = [{transform_indices = @transform_0, window_bounds = array<i64: 1, 32, 256>}, {pipeline_mode = #tpu.pipeline_mode<synchronous>, transform_indices = @transform_1, window_bounds = array<i64: 32, 1>}, {pipeline_mode = #tpu.pipeline_mode<synchronous>, transform_indices = @transform_2, window_bounds = array<i64: 32, 1>}, {transform_indices = @transform_3, window_bounds = array<i64: 1, 32, 256>}]} {
    %c0 = arith.constant 0 : index
    %c0_0 = arith.constant 0 : index
    %c0_1 = arith.constant 0 : index
    %0 = vector.load %arg2[%c0, %c0_0, %c0_1] : memref<1x32x256xbf16, #tpu.memory_space<vmem>>, vector<1x32x256xbf16>
    %1 = vector.shape_cast %0 : vector<1x32x256xbf16> to vector<32x256xbf16>
    %2 = arith.extf %1 : vector<32x256xbf16> to vector<32x256xf32>
    %c0_2 = arith.constant 0 : index
    %c0_3 = arith.constant 0 : index
    %3 = vector.load %arg3[%c0_2, %c0_3] : memref<32x1xf32, #tpu.memory_space<vmem>>, vector<32x1xf32>
    %4 = vector.broadcast %3 : vector<32x1xf32> to vector<32x256xf32>
    %5 = arith.mulf %2, %4 : vector<32x256xf32>
    %c0_4 = arith.constant 0 : index
    %c0_5 = arith.constant 0 : index
    %6 = vector.load %arg4[%c0_4, %c0_5] : memref<32x1xf32, #tpu.memory_space<vmem>>, vector<32x1xf32>
    %7 = vector.broadcast %6 : vector<32x1xf32> to vector<32x256xf32>
    %8 = arith.addf %5, %7 : vector<32x256xf32>
    %cst = arith.constant 0.000000e+00 : f32
    %9 = vector.broadcast %cst : f32 to vector<32x256xf32>
    %10 = arith.maximumf %8, %9 : vector<32x256xf32>
    %c0_6 = arith.constant 0 : index
    %c0_7 = arith.constant 0 : index
    %c0_8 = arith.constant 0 : index
    %11 = vector.load %arg5[%c0_6, %c0_7, %c0_8] : memref<1x32x256xf32, #tpu.memory_space<vmem>>, vector<1x32x256xf32>
    %12 = vector.shape_cast %11 : vector<1x32x256xf32> to vector<32x256xf32>
    %13 = vector.shape_cast %10 : vector<32x256xf32> to vector<1x32x256xf32>
    tpu.vector_store %arg5[%c0_6, %c0_7, %c0_8], %13 {strides = array<i32>} : memref<1x32x256xf32, #tpu.memory_space<vmem>>, vector<1x32x256xf32>,
    return
  }
  func.func @transform_0(%arg0: i32, %arg1: i32) -> (i32, i32, i32) {
    %c0_i32 = arith.constant 0 : i32
    %c0_i32_0 = arith.constant 0 : i32
    return %arg0, %c0_i32, %arg1 : i32, i32, i32
  }
  func.func @transform_1(%arg0: i32, %arg1: i32) -> (i32, i32) {
    %c0_i32 = arith.constant 0 : i32
    %c0_i32_0 = arith.constant 0 : i32
    %c0_i32_1 = arith.constant 0 : i32
    return %c0_i32, %c0_i32_0 : i32, i32
  }
  func.func @transform_2(%arg0: i32, %arg1: i32) -> (i32, i32) {
    %c0_i32 = arith.constant 0 : i32
    %c0_i32_0 = arith.constant 0 : i32
    %c0_i32_1 = arith.constant 0 : i32
    return %c0_i32, %c0_i32_0 : i32, i32
  }
  func.func @transform_3(%arg0: i32, %arg1: i32) -> (i32, i32, i32) {
    %c0_i32 = arith.constant 0 : i32
    %c0_i32_0 = arith.constant 0 : i32
    return %arg0, %c0_i32, %arg1 : i32, i32, i32
  }
}

</mosaic_0001>

<bundles_post_ra>
// kernel: dense_layer_forward.3
= control target key start
LH: loop header
LB: loop body
LE: loop exit
PB: predicated region body
PF: predicated region fallthrough
CT: control target
= control target key end

     0   :  { %s590_s12 = smov 0   ;;  %s592_s13 = smov 0   ;;  %s650_s0 = inlined_call_operand.vmem [shape: f32[2,4,256], index: 0, kind: input, shape index: {}]   ;;  %s651_s1 = inlined_call_operand.vmem [shape: bf16[32,4], index: 1, kind: input, shape index: {}]   ;;  %s652_s2 = inlined_call_operand.vmem [shape: bf16[2,32,256], index: 2, kind: output, shape index: {0}]   ;;  %s653_s3 = inlined_call_operand.vmem [shape: f32[2,32,2], index: 3, kind: output, shape index: {1}]  }
   0x1   :  { %s594_s14 = smov 0  }
   0x2 LB: > { %s26_s15 = sadd.s32 1, %s564_s13  ;;  %p494_p0 = scmp.ge.s32.totalorder %s568_s14, 1  ;;  %s568_s14 = sphi %s594_s14, %s14_s14   ;;  %s564_s13 = sphi %s592_s13, %s655_s13   ;;  %s560_s12 = sphi %s590_s12, %s654_s12  }
   0x3   : > { %p28_p1 = scmp.ge.s32.totalorder %s26_s15, 2  ;;  %p161_p2 = scmp.lt.s32.totalorder %s568_s14, 3 }
   0x5   : > { %s657_s15 = smov (%p28_p1, %s26_s15), 0  ;;  %p162_p3 = pnand %p494_p0, %p161_p2 }
   0x6   : > { %p199_p4 = scmp.lt.s32.totalorder (!%p162_p3), %s560_s12, 1 }
   0x7   : > { %165 = sbr.rel (%p162_p3) target bundleno = 299 (0x12b), region = 28 }
   0xc   : > { %s659_s12 = smov (!%p199_p4, %s560_s12), 1  ;;  %vm254_vm0 = vcmask 1041408   ;;  %v518_v7 = vld [vmem:[%s651_s1] sm:$0xff]  ;;  %v519_v8 = vld [vmem:[%s651_s1 + $0x8] sm:$0xff]  ;;  %vm247_vm1 = vcmask 31744   ;;  %vm339_vm2 = vcmask 7168  }
   0xd   : > { %s515_s16 = sshll.u32 %s659_s12, 3  ;;  %s516_s24 = sshll.u32 %s659_s12, 5  ;;  %vm348_vm3 = vcmask 15360  }
   0xe   : > { %s206_s19 = scalar_lea.vmem %s650_s0, %s515_s16  ;;  %s626_s27 = scalar_lea.vmem %s652_s2, %s516_s24 }
   0xf   : > { %v224_v0 = vld [vmem:[%s206_s19] sm:$0xff]  ;;  %s222_s30 = scalar_lea.vmem %s653_s3, %s516_s24 }
  0x10   : > { %226 = vst [vmem:[#allocation1] ss:$2 sm:$0xff] %v224_v0 }
  0x17   : > { %v227_v1 = vld.sshfl [vmem:[#allocation1] sm:$0xff pattern:$0x75316420]  ;;  %v228_v2 = vld.sshfl [vmem:[#allocation1 + $0x8] sm:$0xff pattern:$0x75316420] }
  0x18   : > { %v231_v3 = vpack.c.bf16 %v227_v1, %v227_v1  ;;  %v232_v4 = vpack.c.bf16 %v228_v2, %v228_v2 }
  0x1a   : > { %v256_v5 = vsel %vm254_vm0, %v231_v3, 0  ;;  %v259_v6 = vsel %vm254_vm0, %v232_v4, 0 }
  0x1b   : > { %268 = vmatpush.bf16.msra.mxu0 %v256_v5  ;;  %520 = vmatpush.bf16.msra.mxu2 %v256_v5 }
  0x1c   : > { %287 = vmatpush.bf16.msra.mxu1 %v259_v6  ;;  %521 = vmatpush.bf16.msra.mxu3 %v259_v6 }
  0x1e   : > { %509 = vmatmul.msk.bf16.vlgmr.msra.gmra.mxu0 %vm247_vm1, %v518_v7  ;;  %510 = vmatmul.msk.bf16.vlgmr.msra.gmra.mxu2 %vm247_vm1, %v519_v8 }
  0x1f   : > { %511 = vmatmul.msk.bf16.vlgmr.msra.gmra.mxu1 %vm247_vm1, %v518_v7  ;;  %512 = vmatmul.msk.bf16.vlgmr.msra.gmra.mxu3 %vm247_vm1, %v519_v8 }
  0x9b   : > { %v270_v9 = vpop.f32.mrf.mxu0 }
  0x9c   : > { %v289_v10 = vpop.f32.mrf.mxu1  ;;  %v319_v11 = vmul.f32 %v270_v9, %v270_v9 }
  0x9d   : > { %v299_v12 = vpack.c.bf16 %v289_v10, %v270_v9  ;;  %v307_v13 = vadd.f32 %v289_v10, %v270_v9  ;;  %v320_v14 = vmul.f32 %v289_v10, %v289_v10 }
  0x9f   : > { %303 = vst [vmem:[%s626_s27] sm:$0xff] %v299_v12  ;;  %308 = vadd.xlane.f32.xlu0 %v307_v13  ;;  %v327_v15 = vadd.f32 %v320_v14, %v319_v11 }
  0xa1   : > { %328 = vadd.xlane.f32.xlu2 %v327_v15  ;;  %v275_v16 = vpop.f32.mrf.mxu2 }
  0xa2   : > { %v294_v17 = vpop.f32.mrf.mxu3  ;;  %v323_v28 = vmul.f32 %v275_v16, %v275_v16 }
  0xa3   : > { %v301_v18 = vpack.c.bf16 %v294_v17, %v275_v16  ;;  %v272_v19 = vpop.f32.mrf.mxu0  ;;  %v313_v20 = vadd.f32 %v294_v17, %v275_v16  ;;  %v324_v29 = vmul.f32 %v294_v17, %v294_v17 }
  0xa4   : > { %v321_v21 = vmul.f32 %v272_v19, %v272_v19  ;;  %v291_v22 = vpop.f32.mrf.mxu1 }
  0xa5   : > { %305 = vst [vmem:[%s626_s27 + $0x10] sm:$0xff] %v301_v18  ;;  %v300_v23 = vpack.c.bf16 %v291_v22, %v272_v19  ;;  %v322_v24 = vmul.f32 %v291_v22, %v291_v22  ;;  %314 = vadd.xlane.f32.xlu1 %v313_v20  ;;  %v310_v25 = vadd.f32 %v291_v22, %v272_v19 }
  0xa6   : > { %v333_v33 = vadd.f32 %v324_v29, %v323_v28 }
  0xa7   : > { %304 = vst [vmem:[%s626_s27 + $0x8] sm:$0xff] %v300_v23  ;;  %311 = vadd.xlane.f32.xlu0 %v310_v25  ;;  %v330_v26 = vadd.f32 %v322_v24, %v321_v21 }
  0xa9   : > { %331 = vadd.xlane.f32.xlu2 %v330_v26  ;;  %v277_v27 = vpop.f32.mrf.mxu2 }
  0xaa   : > { %v296_v30 = vpop.f32.mrf.mxu3  ;;  %v325_v34 = vmul.f32 %v277_v27, %v277_v27 }
  0xab   : > { %v302_v31 = vpack.c.bf16 %v296_v30, %v277_v27  ;;  %v316_v32 = vadd.f32 %v296_v30, %v277_v27  ;;  %v326_v35 = vmul.f32 %v296_v30, %v296_v30 }
  0xad   : > { %306 = vst [vmem:[%s626_s27 + $0x18] sm:$0xff] %v302_v31  ;;  %317 = vadd.xlane.f32.xlu1 %v316_v32  ;;  %v336_v36 = vadd.f32 %v326_v35, %v325_v34 }
  0xaf   : > { %334 = vadd.xlane.f32.xlu0 %v333_v33 }
  0xb5   : > { %337 = vadd.xlane.f32.xlu1 %v336_v36 }
 0x112   : > { %v309_v37 = vpop.xlane.xlu0 %308 }
 0x114   : > { %v329_v38 = vpop.xlane.xlu2 %328 }
 0x115   : > { %v340_v39 = vsel %vm339_vm2, %v309_v37, %v329_v38 }
 0x116   : > { %349 = vst.msk [vmem:[%s222_s30] sm:$0xff] %vm348_vm3, %v340_v39 }
 0x118   : > { %v315_v40 = vpop.xlane.xlu1 %314 }
 0x11a   : > { %v312_v41 = vpop.xlane.xlu0 %311 }
 0x11c   : > { %v332_v42 = vpop.xlane.xlu2 %331 }
 0x11d   : > { %v341_v43 = vsel %vm339_vm2, %v312_v41, %v332_v42 }
 0x11e   : > { %350 = vst.msk [vmem:[%s222_s30 + $0x8] sm:$0xff] %vm348_vm3, %v341_v43 }
 0x120   : > { %v318_v44 = vpop.xlane.xlu1 %317 }
 0x122   : > { %v335_v45 = vpop.xlane.xlu0 %334 }
 0x123   : > { %v342_v46 = vsel %vm339_vm2, %v315_v40, %v335_v45 }
 0x124   : > { %351 = vst.msk [vmem:[%s222_s30 + $0x10] sm:$0xff] %vm348_vm3, %v342_v46 }
 0x128   : > { %v338_v47 = vpop.xlane.xlu1 %337 }
 0x129   : > { %v343_v48 = vsel %vm339_vm2, %v318_v44, %v338_v47 }
 0x12a   : > { %352 = vst.msk [vmem:[%s222_s30 + $0x18] sm:$0xff] %vm348_vm3, %v343_v48 }
 0x12b PF: > { %s14_s14 = sadd.s32 1, %s568_s14   ;;  %s654_s12 = smov %s564_s13 }
 0x12c   : > { %p11_p5 = scmp.ge.s32.totalorder %s14_s14, 4   ;;  %s655_s13 = smov %s657_s15 }
 0x12e   :  { %13 = sbr.rel (!%p11_p5) target bundleno = 2 (0x2), region = 78 }

// kernel: dense_layer_forward.5
= control target key start
LH: loop header
LB: loop body
LE: loop exit
PB: predicated region body
PF: predicated region fallthrough
CT: control target
= control target key end

     0   :  { %s475_s12 = smov 0   ;;  %s477_s13 = smov 0   ;;  %s546_s0 = inlined_call_operand.vmem [shape: bf16[2,32,256], index: 0, kind: input, shape index: {}]   ;;  %s547_s1 = inlined_call_operand.vmem [shape: f32[32,1], index: 1, kind: input, shape index: {}]   ;;  %s548_s2 = inlined_call_operand.vmem [shape: f32[32,1], index: 2, kind: input, shape index: {}]   ;;  %s549_s3 = inlined_call_operand.vmem [shape: f32[2,32,256], index: 3, kind: output, shape index: {}]  }
   0x1   :  { %s479_s14 = smov 0  }
   0x2 LB: > { %s25_s15 = sadd.s32 1, %s448_s13  ;;  %p393_p0 = scmp.ge.s32.totalorder %s452_s14, 1  ;;  %s452_s14 = sphi %s479_s14, %s13_s14   ;;  %s448_s13 = sphi %s477_s13, %s551_s13   ;;  %s444_s12 = sphi %s475_s12, %s550_s12  }
   0x3   : > { %p27_p1 = scmp.ge.s32.totalorder %s25_s15, 2  ;;  %p158_p2 = scmp.lt.s32.totalorder %s452_s14, 3 }
   0x5   : > { %s553_s15 = smov (%p27_p1, %s25_s15), 0  ;;  %p159_p3 = pnand %p393_p0, %p158_p2 }
   0x6   : > { %p191_p4 = scmp.lt.s32.totalorder (!%p159_p3), %s444_s12, 1 }
   0x7   : > { %162 = sbr.rel (%p159_p3) target bundleno = 153 (0x99), region = 32 }
   0xc   : > { %v224_v0 = vld [vmem:[%s547_s1 + $0x10] sm:$0xff]  ;;  %v222_v1 = vld [vmem:[%s547_s1] sm:$0xff]  ;;  %v454_v2 = vmov 0   ;;  %v225_v4 = vld [vmem:[%s547_s1 + $0x18] sm:$0xff]  ;;  %s555_s12 = smov (!%p191_p4, %s444_s12), 1 }
   0xd   : > { %428 = vset.pattern.permute.xlu1 %v454_v2  ;;  %427 = vset.pattern.permute.xlu0 %v454_v2  ;;  %v254_v3 = vld [vmem:[%s548_s2] sm:$0xff]  ;;  %v223_v5 = vld [vmem:[%s547_s1 + $0x8] sm:$0xff]  ;;  %v257_v7 = vld [vmem:[%s548_s2 + $0x18] sm:$0xff]  ;;  %s400_s5 = sshll.u32 %s555_s12, 5  ;;  %s401_s9 = sshll.u32 %s555_s12, 6 }
   0xe   : > { %238 = vperm.xlu1 %428, %v224_v0   ;;  %228 = vperm.xlu0 %427, %v222_v1   ;;  %v255_v6 = vld [vmem:[%s548_s2 + $0x8] sm:$0xff]  ;;  %v256_v8 = vld [vmem:[%s548_s2 + $0x10] sm:$0xff]  ;;  %s198_s8 = scalar_lea.vmem %s546_s0, %s400_s5  ;;  %s527_s16 = scalar_lea.vmem %s549_s3, %s401_s9 }
   0xf   : > { %429 = vset.pattern.permute.xlu2 %v454_v2  ;;  %v210_v9 = vld [vmem:[%s198_s8] sm:$0xff]  ;;  %v211_v17 = vld [vmem:[%s198_s8 + $0x8] sm:$0xff]  ;;  %v212_v24 = vld [vmem:[%s198_s8 + $0x10] sm:$0xff] }
  0x10   : > { %260 = vperm.xlu2 %429, %v254_v3   ;;  %v214_v10 = vunpack.c.l.bf16 %v210_v9  ;;  %v215_v11 = vunpack.c.h.bf16 %v210_v9  ;;  %v216_v22 = vunpack.c.l.bf16 %v211_v17  ;;  %v217_v23 = vunpack.c.h.bf16 %v211_v17  ;;  %v213_v26 = vld [vmem:[%s198_s8 + $0x18] sm:$0xff] }
  0x11   : > { %v218_v30 = vunpack.c.l.bf16 %v212_v24  ;;  %v219_v31 = vunpack.c.h.bf16 %v212_v24  ;;  %v220_v33 = vunpack.c.l.bf16 %v213_v26  ;;  %v221_v34 = vunpack.c.h.bf16 %v213_v26 }
  0x16   : > { %243 = vperm.xlu1 %428, %v225_v4   ;;  %233 = vperm.xlu0 %427, %v223_v5  }
  0x18   : > { %265 = vperm.xlu2 %429, %v255_v6  }
  0x1e   : > { %275 = vperm.xlu1 %428, %v257_v7   ;;  %270 = vperm.xlu0 %427, %v256_v8  }
  0x6a   : > { %v261_v12 = vpop.permute.xlu2 %260 }
  0x72   : > { %v266_v32 = vpop.permute.xlu2 %265 }
  0x80   : > { %v239_v13 = vpop.permute.xlu1 %238  ;;  %v229_v14 = vpop.permute.xlu0 %228 }
  0x81   : > { %v246_v15 = vmul.f32 %v229_v14, %v214_v10  ;;  %v247_v16 = vmul.f32 %v229_v14, %v215_v11  ;;  %v250_v39 = vmul.f32 %v239_v13, %v218_v30  ;;  %v251_v40 = vmul.f32 %v239_v13, %v219_v31 }
  0x83   : > { %v278_v18 = vadd.f32 %v261_v12, %v246_v15  ;;  %v279_v19 = vadd.f32 %v261_v12, %v247_v16 }
  0x85   : > { %v286_v20 = vmax.f32 %v278_v18, 0.0  ;;  %v287_v21 = vmax.f32 %v279_v19, 0.0 }
  0x87   : > { %294 = vst [vmem:[%s527_s16] sm:$0xff] %v286_v20 }
  0x88   : > { %295 = vst [vmem:[%s527_s16 + $0x8] sm:$0xff] %v287_v21  ;;  %v244_v25 = vpop.permute.xlu1 %243  ;;  %v234_v27 = vpop.permute.xlu0 %233 }
  0x89   : > { %v248_v28 = vmul.f32 %v234_v27, %v216_v22  ;;  %v249_v29 = vmul.f32 %v234_v27, %v217_v23  ;;  %v252_v41 = vmul.f32 %v244_v25, %v220_v33  ;;  %v253_v42 = vmul.f32 %v244_v25, %v221_v34 }
  0x8b   : > { %v280_v35 = vadd.f32 %v266_v32, %v248_v28  ;;  %v281_v36 = vadd.f32 %v266_v32, %v249_v29 }
  0x8d   : > { %v288_v37 = vmax.f32 %v280_v35, 0.0  ;;  %v289_v38 = vmax.f32 %v281_v36, 0.0 }
  0x8f   : > { %296 = vst [vmem:[%s527_s16 + $0x10] sm:$0xff] %v288_v37 }
  0x90   : > { %297 = vst [vmem:[%s527_s16 + $0x18] sm:$0xff] %v289_v38  ;;  %v276_v43 = vpop.permute.xlu1 %275  ;;  %v271_v44 = vpop.permute.xlu0 %270 }
  0x91   : > { %v284_v45 = vadd.f32 %v276_v43, %v252_v41  ;;  %v285_v46 = vadd.f32 %v276_v43, %v253_v42  ;;  %v282_v47 = vadd.f32 %v271_v44, %v250_v39  ;;  %v283_v48 = vadd.f32 %v271_v44, %v251_v40 }
  0x93   : > { %v292_v49 = vmax.f32 %v284_v45, 0.0  ;;  %v293_v50 = vmax.f32 %v285_v46, 0.0  ;;  %v290_v51 = vmax.f32 %v282_v47, 0.0  ;;  %v291_v52 = vmax.f32 %v283_v48, 0.0 }
  0x95   : > { %300 = vst [vmem:[%s527_s16 + $0x30] sm:$0xff] %v292_v49 }
  0x96   : > { %301 = vst [vmem:[%s527_s16 + $0x38] sm:$0xff] %v293_v50 }
  0x97   : > { %298 = vst [vmem:[%s527_s16 + $0x20] sm:$0xff] %v290_v51 }
  0x98   : > { %299 = vst [vmem:[%s527_s16 + $0x28] sm:$0xff] %v291_v52 }
  0x99 PF: > { %s13_s14 = sadd.s32 1, %s452_s14   ;;  %s550_s12 = smov %s448_s13 }
  0x9a   : > { %p10_p5 = scmp.ge.s32.totalorder %s13_s14, 4   ;;  %s551_s13 = smov %s553_s15 }
  0x9c   :  { %12 = sbr.rel (!%p10_p5) target bundleno = 2 (0x2), region = 62 }

// kernel: dense_layer_forward.4
= control target key start
LH: loop header
LB: loop body
LE: loop exit
PB: predicated region body
PF: predicated region fallthrough
CT: control target
= control target key end

     0   :  { %s1326_s18 = smov 0   ;;  %s1992_s0 = inlined_call_operand.vmem [shape: bf16[2,32,256], index: 0, kind: input, shape index: {}]   ;;  %s1993_s1 = inlined_call_operand.vmem [shape: f32[32,1], index: 1, kind: input, shape index: {}]   ;;  %s1994_s2 = inlined_call_operand.vmem [shape: f32[32,1], index: 2, kind: input, shape index: {}]   ;;  %s1995_s3 = inlined_call_operand.vmem [shape: bf16[3,32,96], index: 3, kind: input, shape index: {}]   ;;  %s1996_s4 = inlined_call_operand.vmem [shape: bf16[2,32,256], index: 4, kind: output, shape index: {0}]   ;;  %s1997_s5 = inlined_call_operand.vmem [shape: f32[2,32,2], index: 5, kind: output, shape index: {1}]  }
   0x1 LB: > { %s1177_s19 = sadd.s32 4294967295, %s1283_s18   ;;  %p1181_p0 = scmp.ge.s32.totalorder %s1283_s18, 1  ;;  %s1283_s18 = sphi %s1326_s18, %s16_s18  }
   0x2   : > { %p190_p1 = scmp.lt.s32.totalorder %s1283_s18, 3 }
   0x4   : > { %p191_p2 = pnand %p1181_p0, %p190_p1 }
   0x5   : > { %s1286_s11 = smov (!%p191_p2), 18   ;;  %s1287_s12 = smov (!%p191_p2), 2  }
   0x6   : > { %194 = sbr.rel (%p191_p2) target bundleno = 850 (0x352), region = 36  ;;  %s1288_s13 = smov (!%p191_p2), 34  }
   0x7   : > { %s1289_s14 = smov (!%p191_p2), 16   ;;  %s1290_s15 = smov (!%p191_p2), 32  }
   0x8   : > { %p223_p3 = scmp.lt.s32.totalorder (!%p191_p2), %s1177_s19, 1  ;;  %s1292_s22 = smov (!%p191_p2), 127  }
   0x9   : > { %s1293_s23 = smov (!%p191_p2), 126   ;;  %s1294_s24 = smov (!%p191_p2), 112  }
   0xa   : > { %s1295_s25 = smov (!%p191_p2), 96  }
   0xb   : > { %v287_v0 = vld [vmem:[%s1994_s2 + $0x10] sm:$0xff]  ;;  %v325_v2 = vlaneseq  ;;  %v1285_v3 = vmov 0   ;;  %v253_v4 = vld [vmem:[%s1993_s1] sm:$0xff]  ;;  %v288_v7 = vld [vmem:[%s1994_s2 + $0x18] sm:$0xff]  ;;  %s2154_s19 = smov (!%p223_p3, %s1177_s19), 1  ;;  %vm544_vm6 = vcmask 130048  }
   0xc   : > { %v255_v1 = vld [vmem:[%s1993_s1 + $0x10] sm:$0xff]  ;;  %1275 = vset.pattern.permute.xlu1 %v1285_v3  ;;  %1274 = vset.pattern.permute.xlu0 %v1285_v3  ;;  %v256_v8 = vld [vmem:[%s1993_s1 + $0x18] sm:$0xff]  ;;  %v254_v11 = vld [vmem:[%s1993_s1 + $0x8] sm:$0xff]  ;;  %s1375_s16 = sshll.u32 %s2154_s19, 5  ;;  %s1291_s19 = smov 17   ;;  %vm577_vm7 = vcmask 146432  }
   0xd   : > { %301 = vperm.xlu1 %1275, %v287_v0   ;;  %269 = vperm.xlu0 %1274, %v255_v1   ;;  %v326_v5 = vand.u32 127, %v325_v2  ;;  %v286_v12 = vld [vmem:[%s1994_s2 + $0x8] sm:$0xff]  ;;  %v285_v13 = vld [vmem:[%s1994_s2] sm:$0xff]  ;;  %s227_s21 = scalar_lea.vmem %s1992_s0, %s1375_s16  ;;  %vm846_vm8 = vcmask 277504  }
   0xe   : > { %1276 = vset.pattern.permute.xlu2 %v1285_v3  ;;  %v243_v20 = vld [vmem:[%s227_s21 + $0x10] sm:$0xff]  ;;  %v244_v28 = vld [vmem:[%s227_s21 + $0x18] sm:$0xff]  ;;  %v241_v33 = vld [vmem:[%s227_s21] sm:$0xff] }
   0xf   : > { %259 = vperm.xlu2 %1276, %v253_v4   ;;  %v327_v6 = vadd.s32 128, %v326_v5  ;;  %v393_v9 = vand.u32 15, %v326_v5  ;;  %v249_v21 = vunpack.c.l.bf16 %v243_v20  ;;  %v250_v22 = vunpack.c.h.bf16 %v243_v20  ;;  %v242_v36 = vld [vmem:[%s227_s21 + $0x8] sm:$0xff]  ;;  %s237_s21 = scalar_lea.vmem %s1997_s5, %s1375_s16 }
  0x10   : > { %v251_v29 = vunpack.c.l.bf16 %v244_v28  ;;  %v252_v30 = vunpack.c.h.bf16 %v244_v28  ;;  %v245_v41 = vunpack.c.l.bf16 %v241_v33  ;;  %v246_v42 = vunpack.c.h.bf16 %v241_v33 }
  0x11   : > { %v400_v10 = vand.u32 15, %v327_v6  ;;  %vm415_vm0 = vcmp.le.s32.totalorder %v393_v9, 14  ;;  %vm413_vm3 = vcmp.ge.s32.totalorder %v393_v9, 1  ;;  %v247_v45 = vunpack.c.l.bf16 %v242_v36 }
  0x12   : > { %v248_v46 = vunpack.c.h.bf16 %v242_v36  ;;  %v1394_v28 = vunpack.c.l.b16 %v1285_v3  ;;  %v2038_v36 = vmov 0 }
  0x13   : > { %vm416_vm1 = vcmp.le.s32.totalorder %v400_v10, 14  ;;  %vm414_vm4 = vcmp.ge.s32.totalorder %v400_v10, 1 }
  0x14   : > { %vm447_vm2 = vmpackc.low %vm416_vm1, %vm415_vm0 }
  0x15   : > { %306 = vperm.xlu1 %1275, %v288_v7   ;;  %274 = vperm.xlu0 %1274, %v256_v8   ;;  %v448_v14 = vsel %vm447_vm2, 65537, %v1285_v3  ;;  %vm421_vm5 = vmpackc.low %vm414_vm4, %vm413_vm3  ;;  %vm2006_vm3 = vcmask 15360  }
  0x16   : > { %v449_v15 = vperm.slane %v448_v14, 0  ;;  %v450_v16 = vperm.slane %v448_v14, 4  ;;  %v422_v17 = vsel %vm421_vm5, 65537, %v1285_v3 }
  0x17   : > { %264 = vperm.xlu2 %1276, %v254_v11   ;;  %v1363_v18 = vperm.slane %v422_v17, 4  ;;  %v1366_v19 = vperm.slane %v422_v17, 0 }
  0x1d   : > { %296 = vperm.xlu1 %1275, %v286_v12   ;;  %291 = vperm.xlu0 %1274, %v285_v13  }
  0x1f   : > { %573 = vrot.lane.b32.xlu2 %v449_v15, %s1286_s11 }
  0x25   : > { %575 = vrot.lane.b32.xlu0 %v450_v16, %s1286_s11  ;;  %451 = vrot.lane.b32.xlu1 %v449_v15, %s1287_s12 }
  0x27   : > { %842 = vrot.lane.b32.xlu2 %v449_v15, %s1288_s13 }
  0x2d   : > { %844 = vrot.lane.b32.xlu0 %v450_v16, %s1288_s13  ;;  %542 = vrot.lane.b32.xlu1 %v1363_v18, %s1289_s14 }
  0x2f   : > { %453 = vrot.lane.b32.xlu2 %v450_v16, %s1287_s12 }
  0x35   : > { %540 = vrot.lane.b32.xlu0 %v1366_v19, %s1289_s14 }
  0x37   : > { %809 = vrot.lane.b32.xlu2 %v1366_v19, %s1290_s15 }
  0x3d   : > { %811 = vrot.lane.b32.xlu0 %v1363_v18, %s1290_s15  ;;  %s1975_s15 = scalar_lea.vmem %s1996_s4, %s1375_s16 }
  0x69   : > { %v260_v27 = vpop.permute.xlu2 %259 }
  0x6a   : > { %v277_v51 = vmul.f32 %v260_v27, %v245_v41  ;;  %v278_v52 = vmul.f32 %v260_v27, %v246_v42 }
  0x71   : > { %v265_v47 = vpop.permute.xlu2 %264 }
  0x72   : > { %v279_v54 = vmul.f32 %v265_v47, %v247_v45  ;;  %v280_v55 = vmul.f32 %v265_v47, %v248_v46 }
  0x7f   : > { %v302_v23 = vpop.permute.xlu1 %301  ;;  %v270_v24 = vpop.permute.xlu0 %269 }
  0x80   : > { %v281_v25 = vmul.f32 %v270_v24, %v249_v21  ;;  %v282_v26 = vmul.f32 %v270_v24, %v250_v22 }
  0x82   : > { %v313_v31 = vadd.f32 %v302_v23, %v281_v25  ;;  %v314_v32 = vadd.f32 %v302_v23, %v282_v26  ;;  %v574_v25 = vpop.permute.xlu2 %573 }
  0x84   : > { %v321_v39 = vmax.f32 %v313_v31, 0.0  ;;  %v322_v40 = vmax.f32 %v314_v32, 0.0  ;;  %v580_v31 = vunpack.c.h.b16 %v574_v25 }
  0x86   : > { %v344_v50 = vpack.c.bf16 %v322_v40, %v321_v39 }
  0x87   : > { %v307_v34 = vpop.permute.xlu1 %306  ;;  %v275_v35 = vpop.permute.xlu0 %274 }
  0x88   : > { %v283_v37 = vmul.f32 %v275_v35, %v251_v29  ;;  %v284_v38 = vmul.f32 %v275_v35, %v252_v30  ;;  %v355_v62 = vunpack.c.h.b16 %v344_v50  ;;  %v354_v0 = vunpack.c.l.b16 %v344_v50 }
  0x89   : > { %v1397_v29 = vunpack.c.h.b16 %v1285_v3  ;;  %v579_v30 = vunpack.c.l.b16 %v574_v25  ;;  %v2036_v35 = vmov 0  ;;  %v2040_v3 = vmov 0 }
  0x8a   : > { %v315_v43 = vadd.f32 %v307_v34, %v283_v37  ;;  %v316_v44 = vadd.f32 %v307_v34, %v284_v38  ;;  %v843_v26 = vpop.permute.xlu2 %842  ;;  %v2042_v38 = vmov 0  ;;  %v2044_v50 = vmov 0 }
  0x8b   : > { %vm1400_vm9 = vcmp.ne.s32.totalorder %v579_v30, %v1394_v28  ;;  %vm1405_vm10 = vcmp.ne.s32.totalorder %v580_v31, %v1397_v29  ;;  %v849_v45 = vunpack.c.h.b16 %v843_v26  ;;  %v433_v30 = vunpack.c.h.b16 %v1363_v18 }
  0x8c   : > { %v323_v48 = vmax.f32 %v315_v43, 0.0  ;;  %v324_v49 = vmax.f32 %v316_v44, 0.0  ;;  %v2037_v35 = vsel %vm1400_vm9, 4294967295, %v2036_v35  ;;  %v2039_v36 = vsel %vm1405_vm10, 4294967295, %v2038_v36 }
  0x8d   : > { %v848_v44 = vunpack.c.l.b16 %v843_v26  ;;  %vm1454_vm5 = vcmp.ne.s32.totalorder %v849_v45, %v1397_v29  ;;  %vm813_vm9 = vcmask 261120  }
  0x8e   : > { %v345_v53 = vpack.c.bf16 %v324_v49, %v323_v48 }
  0x8f   : > { %v297_v56 = vpop.permute.xlu1 %296  ;;  %v292_v57 = vpop.permute.xlu0 %291  ;;  %vm1449_vm4 = vcmp.ne.s32.totalorder %v848_v44, %v1394_v28 }
  0x90   : > { %v311_v58 = vadd.f32 %v297_v56, %v279_v54  ;;  %v312_v59 = vadd.f32 %v297_v56, %v280_v55  ;;  %v309_v60 = vadd.f32 %v292_v57, %v277_v51  ;;  %v310_v61 = vadd.f32 %v292_v57, %v278_v52 }
  0x91   : > { %v357_v63 = vunpack.c.h.b16 %v345_v53  ;;  %v356_v1 = vunpack.c.l.b16 %v345_v53  ;;  %v2046_v51 = vmov 0  ;;  %v2048_v52 = vmov 0 }
  0x92   : > { %v319_v2 = vmax.f32 %v311_v58, 0.0  ;;  %v320_v4 = vmax.f32 %v312_v59, 0.0  ;;  %v317_v5 = vmax.f32 %v309_v60, 0.0  ;;  %v318_v6 = vmax.f32 %v310_v61, 0.0  ;;  %v454_v34 = vpop.permute.xlu2 %453 }
  0x93   : > { %v361_v7 = vpack.c.b16 %v357_v63, %v355_v62  ;;  %v360_v8 = vpack.c.b16 %v356_v1, %v354_v0  ;;  %v471_v37 = vunpack.c.l.b16 %v454_v34  ;;  %v472_v40 = vunpack.c.h.b16 %v454_v34 }
  0x94   : > { %v343_v9 = vpack.c.bf16 %v320_v4, %v319_v2  ;;  %v342_v10 = vpack.c.bf16 %v318_v6, %v317_v5  ;;  %v2050_v53 = vmov 0  ;;  %v2052_v54 = vmov 0 }
  0x95   : > { %368 = vrot.lane.b32.xlu2 %v361_v7, %s1291_s19  ;;  %366 = vrot.lane.b32.xlu1 %v360_v8, %s1291_s19  ;;  %vm1429_vm15 = vcmp.ne.s32.totalorder %v471_v37, %v1394_v28  ;;  %vm1434_vm0 = vcmp.ne.s32.totalorder %v472_v40, %v1397_v29  ;;  %v2053_v54 = vsel %vm1449_vm4, 4294967295, %v2052_v54  ;;  %v2054_v55 = vmov 0 }
  0x96   : > { %v350_v11 = vunpack.c.l.b16 %v342_v10  ;;  %v352_v12 = vunpack.c.l.b16 %v343_v9  ;;  %v351_v13 = vunpack.c.h.b16 %v342_v10  ;;  %v353_v14 = vunpack.c.h.b16 %v343_v9 }
  0x97   : > { %v1381_v15 = vpop.permute.xlu0 %575  ;;  %v1383_v20 = vpop.permute.xlu1 %451  ;;  %v2045_v50 = vsel %vm1429_vm15, 4294967295, %v2044_v50  ;;  %v2047_v51 = vsel %vm1434_vm0, 4294967295, %v2046_v51  ;;  %v2055_v55 = vsel %vm1454_vm5, 4294967295, %v2054_v55  ;;  %v2056_v56 = vmov 0 }
  0x98   : > { %v358_v16 = vpack.c.b16 %v352_v12, %v350_v11  ;;  %v359_v17 = vpack.c.b16 %v353_v14, %v351_v13  ;;  %v578_v27 = vsel %vm577_vm7, %v574_v25, %v1381_v15  ;;  %v2058_v57 = vmov 0 }
  0x99   : > { %v586_v32 = vunpack.c.l.b16 %v578_v27  ;;  %v587_v33 = vunpack.c.h.b16 %v578_v27  ;;  %v456_v60 = vsel %vm2006_vm3, %v1383_v20, %v454_v34  ;;  %v2064_v0 = vmov 0 }
  0x9a   : > { %362 = vrot.lane.b32.xlu0 %v358_v16, %s1291_s19  ;;  %v464_v61 = vunpack.c.l.b16 %v456_v60  ;;  %v465_v62 = vunpack.c.h.b16 %v456_v60  ;;  %v810_v63 = vpop.permute.xlu2 %809  ;;  %v2066_v1 = vmov 0  ;;  %v2068_v12 = vmov 0 }
  0x9b   : > { %vm1410_vm11 = vcmp.ne.s32.totalorder %v586_v32, %v1394_v28  ;;  %vm1415_vm12 = vcmp.ne.s32.totalorder %v587_v33, %v1397_v29  ;;  %v815_v10 = vunpack.c.l.b16 %v810_v63  ;;  %v816_v11 = vunpack.c.h.b16 %v810_v63 }
  0x9c   : > { %v2041_v3 = vsel %vm1410_vm11, 4294967295, %v2040_v3  ;;  %v2043_v38 = vsel %vm1415_vm12, 4294967295, %v2042_v38  ;;  %vm1501_vm10 = vcmp.ne.s32.totalorder %v464_v61, %v1394_v28  ;;  %vm1506_vm3 = vcmp.ne.s32.totalorder %v465_v62, %v1397_v29 }
  0x9d   : > { %364 = vrot.lane.b32.xlu1 %v359_v17, %s1291_s19  ;;  %v2065_v0 = vsel %vm1501_vm10, 4294967295, %v2064_v0  ;;  %v2067_v1 = vsel %vm1506_vm3, 4294967295, %v2066_v1  ;;  %v2070_v13 = vmov 0  ;;  %v2072_v14 = vmov 0 }
  0x9e   : > { %v2074_v16 = vmov 0  ;;  %vm1557_vm11 = vcmp.ne.s32.totalorder %v815_v10, %v1394_v28  ;;  %vm1562_vm10 = vcmp.ne.s32.totalorder %v816_v11, %v1397_v29  ;;  %v425_v25 = vunpack.c.l.b16 %v1366_v19 }
  0x9f   : > { %v1385_v21 = vpop.permute.xlu0 %844  ;;  %v543_v23 = vpop.permute.xlu1 %542  ;;  %v432_v27 = vunpack.c.l.b16 %v1363_v18  ;;  %v593_v44 = vunpack.c.l.b16 %v1381_v15  ;;  %v594_v45 = vunpack.c.h.b16 %v1381_v15 }
  0xa0   : > { %v847_v39 = vsel %vm846_vm8, %v843_v26, %v1385_v21  ;;  %v560_v41 = vunpack.c.l.b16 %v543_v23  ;;  %v561_v42 = vunpack.c.h.b16 %v543_v23  ;;  %v426_v26 = vunpack.c.h.b16 %v1366_v19 }
  0xa1   : > { %v855_v46 = vunpack.c.l.b16 %v847_v39  ;;  %v856_v47 = vunpack.c.h.b16 %v847_v39 }
  0xa2   : > { %vm1439_vm1 = vcmp.ne.s32.totalorder %v560_v41, %v1394_v28  ;;  %vm1444_vm2 = vcmp.ne.s32.totalorder %v561_v42, %v1397_v29  ;;  %vm1584_vm12 = vcmp.ne.s32.totalorder %v426_v26, %v1397_v29 }
  0xa3   : > { %v2049_v52 = vsel %vm1439_vm1, 4294967295, %v2048_v52  ;;  %v2051_v53 = vsel %vm1444_vm2, 4294967295, %v2050_v53  ;;  %vm1467_vm8 = vcmp.ne.s32.totalorder %v855_v46, %v1394_v28  ;;  %vm1472_vm13 = vcmp.ne.s32.totalorder %v856_v47, %v1397_v29 }
  0xa4   : > { %v2057_v56 = vsel %vm1467_vm8, 4294967295, %v2056_v56  ;;  %v2059_v57 = vsel %vm1472_vm13, 4294967295, %v2058_v57  ;;  %vm1589_vm13 = vcmp.ne.s32.totalorder %v432_v27, %v1394_v28 }
  0xa7   : > { %v1387_v22 = vpop.permute.xlu0 %540 }
  0xa8   : > { %v1390_v24 = vsel %vm544_vm6, %v1387_v22, %v543_v23  ;;  %v546_v4 = vunpack.c.l.b16 %v1387_v22  ;;  %v547_v5 = vunpack.c.h.b16 %v1387_v22  ;;  %v2080_v23 = vmov 0 }
  0xa9   : > { %v553_v6 = vunpack.c.l.b16 %v1390_v24  ;;  %v554_v7 = vunpack.c.h.b16 %v1390_v24  ;;  %v2081_v23 = vsel %vm1557_vm11, 4294967295, %v2080_v23  ;;  %v2082_v24 = vmov 0 }
  0xaa   : > { %vm1519_vm5 = vcmp.ne.s32.totalorder %v546_v4, %v1394_v28  ;;  %v2083_v24 = vsel %vm1562_vm10, 4294967295, %v2082_v24  ;;  %vm2031_vm11 = vcmask 138240   ;;  %vm2092_vm10 = vmpackc.low %vm1434_vm0, %vm1429_vm15  ;;  %v862_v22 = vunpack.c.l.b16 %v1385_v21 }
  0xab   : > { %v2069_v12 = vsel %vm1519_vm5, 4294967295, %v2068_v12  ;;  %vm1529_vm7 = vcmp.ne.s32.totalorder %v553_v6, %v1394_v28  ;;  %vm1534_vm4 = vcmp.ne.s32.totalorder %v554_v7, %v1397_v29  ;;  %vm2093_vm5 = vmpackc.low %vm1444_vm2, %vm1439_vm1  ;;  %vm2101_vm2 = vcmask 138240  }
  0xac   : > { %v2073_v14 = vsel %vm1529_vm7, 4294967295, %v2072_v14  ;;  %v2075_v16 = vsel %vm1534_vm4, 4294967295, %v2074_v16  ;;  %vm1579_vm7 = vcmp.ne.s32.totalorder %v425_v25, %v1394_v28  ;;  %vm1594_vm4 = vcmp.ne.s32.totalorder %v433_v30, %v1397_v29 }
  0xad   : > { %vm2099_vm1 = vmpackc.low %vm1584_vm12, %vm1579_vm7  ;;  %vm2103_vm15 = vnez %v2069_v12 }
  0xaf   : > { %v812_v43 = vpop.permute.xlu0 %811 }
  0xb0   : > { %v829_v48 = vunpack.c.l.b16 %v812_v43  ;;  %v830_v49 = vunpack.c.h.b16 %v812_v43  ;;  %v814_v2 = vsel %vm813_vm9, %v810_v63, %v812_v43  ;;  %vm1524_vm9 = vcmp.ne.s32.totalorder %v547_v5, %v1397_v29 }
  0xb1   : > { %v822_v8 = vunpack.c.l.b16 %v814_v2  ;;  %v823_v9 = vunpack.c.h.b16 %v814_v2  ;;  %v2071_v13 = vsel %vm1524_vm9, 4294967295, %v2070_v13 }
  0xb2   : > { %vm1477_vm14 = vcmp.ne.s32.totalorder %v829_v48, %v1394_v28  ;;  %vm1482_vm6 = vcmp.ne.s32.totalorder %v830_v49, %v1397_v29 }
  0xb3   : > { %vm1543_vm3 = vcmp.ne.s32.totalorder %v822_v8, %v1394_v28  ;;  %vm1548_vm8 = vcmp.ne.s32.totalorder %v823_v9, %v1397_v29  ;;  %vm2094_vm9 = vmpackc.low %vm1482_vm6, %vm1477_vm14 }
  0xef   : > { %v369_v18 = vpop.permute.xlu2 %368 }
  0xf0   : > { %v387_v34 = vsel %vm2031_vm11, %v369_v18, 0 }
  0xf1   : > { %498 = vrot.lane.b32.xlu2 %v387_v34, %s1292_s22  ;;  %v1612_v37 = vsel %vm2092_vm10, %v387_v34, 0  ;;  %v1619_v39 = vsel %vm2093_vm5, %v387_v34, 0  ;;  %v1626_v40 = vsel %vm2094_vm9, %v387_v34, 0  ;;  %vm2095_vm10 = vmpackc.low %vm1548_vm8, %vm1543_vm3  ;;  %vm2096_vm5 = vnez %v2083_v24 }
  0xf2   : > { %vm2097_vm9 = vnez %v2081_v23  ;;  %v863_v23 = vunpack.c.h.b16 %v1385_v21 }
 0x107   : > { %v367_v41 = vpop.permute.xlu1 %366 }
 0x108   : > { %v1629_v42 = vsel %vm2031_vm11, %v367_v41, %v369_v18  ;;  %v1632_v43 = vsel %vm2031_vm11, 0, %v367_v41  ;;  %vm2098_vm11 = vmpackc.low %vm2096_vm5, %vm2097_vm9 }
 0x109   : > { %496 = vrot.lane.b32.xlu1 %v1629_v42, %s1292_s22  ;;  %494 = vrot.lane.b32.xlu0 %v1632_v43, %s1292_s22  ;;  %v1644_v46 = vsel %vm2095_vm10, %v1629_v42, 0  ;;  %v1652_v47 = vsel %vm2098_vm11, %v1632_v43, 0  ;;  %v1660_v15 = vsel %vm2099_vm1, %v1632_v43, 0  ;;  %vm2100_vm10 = vmpackc.low %vm1594_vm4, %vm1589_vm13  ;;  %vm2102_vm11 = vnez %v2071_v13 }
 0x10a   : > { %v1668_v48 = vsel %vm2100_vm10, %v1629_v42, 0  ;;  %vm2104_vm0 = vmpackc.low %vm2102_vm11, %vm2103_vm15  ;;  %vm1679_vm1 = vcmp.ne.s32.totalorder %v593_v44, %v1394_v28  ;;  %vm1684_vm10 = vcmp.ne.s32.totalorder %v594_v45, %v1397_v29  ;;  %vm2111_vm15 = vcmask 138240  }
 0x10b   : > { %vm2112_vm11 = vmmov %vm2111_vm15 }
 0x10c   : > { %v363_v49 = vpop.permute.xlu0 %362 }
 0x10d   : > { %v378_v60 = vsel %vm2101_vm2, 0, %v363_v49  ;;  %vm2109_vm2 = vmpackc.low %vm2096_vm5, %vm2097_vm9 }
 0x10e   : > { %488 = vrot.lane.b32.xlu2 %v378_v60, %s1292_s22  ;;  %v1676_v61 = vsel %vm2104_vm0, %v378_v60, 0  ;;  %v1693_v4 = vsel %vm2109_vm2, %v378_v60, 0  ;;  %vm2110_vm0 = vmpackc.low %vm1584_vm12, %vm1579_vm7  ;;  %vm2124_vm2 = vnez %v2055_v55 }
 0x10f   : > { %v365_v62 = vpop.permute.xlu1 %364  ;;  %v1700_v5 = vsel %vm2110_vm0, %v378_v60, 0  ;;  %vm599_vm5 = vmpackc.low %vm1684_vm10, %vm1679_vm1  ;;  %vm866_vm1 = vcmp.ne.s32.totalorder %v862_v22, %v1394_v28  ;;  %vm867_vm10 = vcmp.ne.s32.totalorder %v863_v23, %v1397_v29  ;;  %vm2125_vm0 = vnez %v2053_v54 }
 0x110   : > { %v371_v6 = vsel %vm2111_vm15, %v363_v49, %v365_v62  ;;  %v384_v7 = vsel %vm2112_vm11, %v365_v62, 0  ;;  %vm2113_vm9 = vmpackc.low %vm1482_vm6, %vm1477_vm14  ;;  %v605_v59 = vsel %vm599_vm5, %v387_v34, 0  ;;  %vm2116_vm14 = vnez %v2043_v38 }
 0x111   : > { %492 = vrot.lane.b32.xlu1 %v384_v7, %s1292_s22  ;;  %490 = vrot.lane.b32.xlu0 %v371_v6, %s1292_s22  ;;  %v1713_v8 = vsel %vm2113_vm9, %v384_v7, 0  ;;  %vm2114_vm12 = vmpackc.low %vm1548_vm8, %vm1543_vm3  ;;  %vm2117_vm6 = vnez %v2041_v3  ;;  %vm2119_vm3 = vnez %v2039_v36  ;;  %vm2120_vm8 = vnez %v2037_v35 }
 0x112   : > { %v1720_v9 = vsel %vm2114_vm12, %v371_v6, 0  ;;  %vm2115_vm15 = vmpackc.low %vm1594_vm4, %vm1589_vm13  ;;  %v602_v17 = vsel %vm599_vm5, %v384_v7, 0  ;;  %vm2127_vm12 = vnez %v2059_v57  ;;  %v457_v3 = vunpack.c.l.b16 %v1383_v20 }
 0x113   : > { %v1727_v10 = vsel %vm2115_vm15, %v371_v6, 0  ;;  %vm2118_vm7 = vmpackc.low %vm2116_vm14, %vm2117_vm6  ;;  %vm2128_vm15 = vnez %v2057_v56  ;;  %v458_v38 = vunpack.c.h.b16 %v1383_v20 }
 0x114   : > { %v604_v58 = vsel %vm2118_vm7, %v1629_v42, 0  ;;  %vm2121_vm11 = vmpackc.low %vm2119_vm3, %vm2120_vm8  ;;  %vm461_vm3 = vcmp.ne.s32.totalorder %v457_v3, %v1394_v28 }
 0x115   : > { %v603_v11 = vsel %vm2121_vm11, %v1632_v43, 0  ;;  %vm2122_vm13 = vmmov %vm2121_vm11  ;;  %vm462_vm8 = vcmp.ne.s32.totalorder %v458_v38, %v1397_v29 }
 0x116   : > { %622 = vrot.lane.b32.xlu2 %v605_v59, %s1293_s23  ;;  %v600_v24 = vsel %vm2122_vm13, %v378_v60, 0  ;;  %vm2123_vm4 = vmmov %vm2118_vm7  ;;  %vm2132_vm13 = vnez %v2067_v1 }
 0x117   : > { %v601_v25 = vsel %vm2123_vm4, %v371_v6, 0  ;;  %vm2126_vm5 = vmpackc.low %vm2124_vm2, %vm2125_vm0  ;;  %vm2133_vm4 = vnez %v2065_v0  ;;  %vm2136_vm2 = vnez %v2047_v51  ;;  %vm2137_vm0 = vnez %v2045_v50 }
 0x118   : > { %v872_v21 = vsel %vm2126_vm5, %v1632_v43, 0  ;;  %vm868_vm9 = vmpackc.low %vm867_vm10, %vm866_vm1 }
 0x119   : > { %620 = vrot.lane.b32.xlu1 %v604_v58, %s1293_s23  ;;  %618 = vrot.lane.b32.xlu0 %v603_v11, %s1293_s23  ;;  %vm2129_vm14 = vmpackc.low %vm2127_vm12, %vm2128_vm15  ;;  %v874_v36 = vsel %vm868_vm9, %v387_v34, 0  ;;  %v871_v30 = vsel %vm868_vm9, %v384_v7, 0  ;;  %vm2139_vm9 = vnez %v2075_v16  ;;  %vm2140_vm12 = vnez %v2073_v14 }
 0x11a   : > { %v873_v35 = vsel %vm2129_vm14, %v1629_v42, 0  ;;  %vm2130_vm6 = vmmov %vm2126_vm5 }
 0x11b   : > { %v869_v26 = vsel %vm2130_vm6, %v378_v60, 0  ;;  %vm2131_vm7 = vmmov %vm2129_vm14  ;;  %vm2142_vm14 = vnez %v2071_v13  ;;  %vm2143_vm6 = vnez %v2069_v12 }
 0x11c   : > { %v870_v27 = vsel %vm2131_vm7, %v371_v6, 0  ;;  %vm463_vm11 = vmpackc.low %vm462_vm8, %vm461_vm3  ;;  %vm2146_vm8 = vnez %v2051_v53 }
 0x11d   : > { %v481_v20 = vsel %vm463_vm11, %v1632_v43, 0  ;;  %vm2134_vm1 = vmpackc.low %vm2132_vm13, %vm2133_vm4  ;;  %v478_v55 = vsel %vm463_vm11, %v378_v60, 0  ;;  %vm2147_vm11 = vnez %v2049_v52  ;;  %vm500_vm4 = vcmask 1039360  }
 0x11e   : > { %616 = vrot.lane.b32.xlu2 %v602_v17, %s1293_s23  ;;  %v482_v54 = vsel %vm2134_vm1, %v1629_v42, 0  ;;  %vm2135_vm10 = vmmov %vm2134_vm1  ;;  %vm527_vm1 = vcmask 1031168  }
 0x11f   : > { %v479_v28 = vsel %vm2135_vm10, %v371_v6, 0  ;;  %vm2138_vm5 = vmpackc.low %vm2136_vm2, %vm2137_vm0  ;;  %vm710_vm10 = vcmask 785408   ;;  %vm685_vm2 = vcmask 916480   ;;  %vm1079_vm0 = vcmask 7168  }
 0x120   : > { %v480_v29 = vsel %vm2138_vm5, %v384_v7, 0  ;;  %vm2141_vm15 = vmpackc.low %vm2139_vm9, %vm2140_vm12  ;;  %vm2149_vm5 = vcmask 15360  }
 0x121   : > { %612 = vrot.lane.b32.xlu0 %v600_v24, %s1293_s23  ;;  %614 = vrot.lane.b32.xlu1 %v601_v25, %s1293_s23  ;;  %v571_v56 = vsel %vm2141_vm15, %v1629_v42, 0  ;;  %vm2144_vm7 = vmpackc.low %vm2142_vm14, %vm2143_vm6 }
 0x122   : > { %v570_v50 = vsel %vm2144_vm7, %v1632_v43, 0  ;;  %vm2145_vm3 = vmmov %vm2141_vm15 }
 0x123   : > { %v568_v51 = vsel %vm2145_vm3, %v371_v6, 0  ;;  %vm2148_vm13 = vmpackc.low %vm2146_vm8, %vm2147_vm11 }
 0x124   : > { %v569_v57 = vsel %vm2148_vm13, %v384_v7, 0  ;;  %vm2150_vm9 = vmmov %vm2149_vm5 }
 0x125   : > { %vm2151_vm12 = vmmov %vm2149_vm5 }
 0x126   : > { %887 = vrot.lane.b32.xlu2 %v872_v21, %s1293_s23  ;;  %vm2152_vm15 = vmmov %vm2149_vm5 }
 0x129   : > { %889 = vrot.lane.b32.xlu0 %v873_v35, %s1293_s23  ;;  %891 = vrot.lane.b32.xlu1 %v874_v36, %s1293_s23 }
 0x12e   : > { %881 = vrot.lane.b32.xlu2 %v869_v26, %s1293_s23 }
 0x131   : > { %883 = vrot.lane.b32.xlu0 %v870_v27, %s1293_s23  ;;  %885 = vrot.lane.b32.xlu1 %v871_v30, %s1293_s23 }
 0x136   : > { %521 = vrot.lane.b32.xlu2 %v481_v20, %s1293_s23 }
 0x139   : > { %523 = vrot.lane.b32.xlu0 %v482_v54, %s1293_s23  ;;  %525 = vrot.lane.b32.xlu1 %v1612_v37, %s1293_s23 }
 0x13e   : > { %517 = vrot.lane.b32.xlu2 %v479_v28, %s1293_s23 }
 0x141   : > { %519 = vrot.lane.b32.xlu0 %v480_v29, %s1293_s23  ;;  %515 = vrot.lane.b32.xlu1 %v478_v55, %s1293_s23 }
 0x146   : > { %657 = vrot.lane.b32.xlu2 %v571_v56, %s1294_s24 }
 0x149   : > { %659 = vrot.lane.b32.xlu0 %v1619_v39, %s1294_s24  ;;  %655 = vrot.lane.b32.xlu1 %v570_v50, %s1294_s24  ;;  %v1238_v50 = vld [vmem:[%s1995_s3 + $0x8] sm:$0xff] }
 0x14b   : > { %v499_v0 = vpop.permute.xlu2 %498 }
 0x14e   : > { %651 = vrot.lane.b32.xlu2 %v568_v51, %s1294_s24 }
 0x151   : > { %653 = vrot.lane.b32.xlu0 %v569_v57, %s1294_s24  ;;  %649 = vrot.lane.b32.xlu1 %v1676_v61, %s1294_s24 }
 0x159   : > { %671 = vrot.lane.b32.xlu0 %v499_v0, %s1294_s24 }
 0x168   : > { %v489_v1 = vpop.permute.xlu2 %488 }
 0x170   : > { %v623_v52 = vpop.permute.xlu2 %622 }
 0x178   : > { %v617_v19 = vpop.permute.xlu2 %616 }
 0x17b   : > { %v497_v12 = vpop.permute.xlu1 %496  ;;  %v495_v13 = vpop.permute.xlu0 %494 }
 0x17c   : > { %v1848_v14 = vsel %vm500_vm4, %v497_v12, %v499_v0  ;;  %v1850_v16 = vsel %vm500_vm4, %v495_v13, %v497_v12 }
 0x17d   : > { %669 = vrot.lane.b32.xlu2 %v1848_v14, %s1294_s24  ;;  %667 = vrot.lane.b32.xlu1 %v1850_v16, %s1294_s24 }
 0x180   : > { %v888_v43 = vpop.permute.xlu2 %887 }
 0x183   : > { %v493_v53 = vpop.permute.xlu1 %492  ;;  %v491_v31 = vpop.permute.xlu0 %490 }
 0x184   : > { %665 = vrot.lane.b32.xlu0 %v493_v53, %s1294_s24  ;;  %v502_v32 = vsel %vm500_vm4, %v491_v31, %v493_v53  ;;  %v501_v33 = vsel %vm500_vm4, %v489_v1, %v491_v31 }
 0x185   : > { %663 = vrot.lane.b32.xlu2 %v502_v32, %s1294_s24  ;;  %661 = vrot.lane.b32.xlu1 %v501_v33, %s1294_s24 }
 0x188   : > { %v882_v61 = vpop.permute.xlu2 %881 }
 0x18b   : > { %v621_v18 = vpop.permute.xlu1 %620  ;;  %v619_v34 = vpop.permute.xlu0 %618 }
 0x18c   : > { %683 = vrot.lane.b32.xlu0 %v623_v52, %s1294_s24  ;;  %v627_v37 = vsel %vm527_vm1, %v621_v18, %v623_v52  ;;  %v626_v39 = vsel %vm527_vm1, %v619_v34, %v621_v18 }
 0x18d   : > { %681 = vrot.lane.b32.xlu2 %v627_v37, %s1294_s24  ;;  %679 = vrot.lane.b32.xlu1 %v626_v39, %s1294_s24 }
 0x190   : > { %v522_v2 = vpop.permute.xlu2 %521 }
 0x193   : > { %v615_v41 = vpop.permute.xlu1 %614  ;;  %v613_v42 = vpop.permute.xlu0 %612 }
 0x194   : > { %677 = vrot.lane.b32.xlu0 %v617_v19, %s1294_s24  ;;  %v625_v44 = vsel %vm527_vm1, %v615_v41, %v617_v19  ;;  %v624_v45 = vsel %vm527_vm1, %v613_v42, %v615_v41  ;;  %v1239_v42 = vld [vmem:[%s1995_s3 + $0x10] sm:$0xff] }
 0x195   : > { %675 = vrot.lane.b32.xlu2 %v625_v44, %s1294_s24  ;;  %673 = vrot.lane.b32.xlu1 %v624_v45, %s1294_s24 }
 0x198   : > { %v518_v22 = vpop.permute.xlu2 %517 }
 0x19b   : > { %v892_v49 = vpop.permute.xlu1 %891  ;;  %v890_v60 = vpop.permute.xlu0 %889 }
 0x19c   : > { %952 = vrot.lane.b32.xlu0 %v892_v49, %s1295_s25  ;;  %v896_v59 = vsel %vm527_vm1, %v890_v60, %v892_v49  ;;  %v895_v58 = vsel %vm527_vm1, %v888_v43, %v890_v60 }
 0x19d   : > { %938 = vrot.lane.b32.xlu2 %v1848_v14, %s1295_s25  ;;  %936 = vrot.lane.b32.xlu1 %v1850_v16, %s1295_s25 }
 0x1a0   : > { %v658_v3 = vpop.permute.xlu2 %657 }
 0x1a3   : > { %v886_v62 = vpop.permute.xlu1 %885  ;;  %v884_v63 = vpop.permute.xlu0 %883 }
 0x1a4   : > { %946 = vrot.lane.b32.xlu0 %v886_v62, %s1295_s25  ;;  %v894_v25 = vsel %vm527_vm1, %v884_v63, %v886_v62  ;;  %v893_v21 = vsel %vm527_vm1, %v882_v61, %v884_v63 }
 0x1a5   : > { %932 = vrot.lane.b32.xlu2 %v502_v32, %s1295_s25  ;;  %930 = vrot.lane.b32.xlu1 %v501_v33, %s1295_s25 }
 0x1ab   : > { %v526_v6 = vpop.permute.xlu1 %525  ;;  %v524_v7 = vpop.permute.xlu0 %523 }
 0x1ac   : > { %940 = vrot.lane.b32.xlu0 %v499_v0, %s1295_s25  ;;  %v530_v11 = vsel %vm527_vm1, %v522_v2, %v524_v7  ;;  %v531_v17 = vsel %vm527_vm1, %v524_v7, %v526_v6  ;;  %v1240_v2 = vld [vmem:[%s1995_s3 + $0x18] sm:$0xff] }
 0x1ad   : > { %950 = vrot.lane.b32.xlu2 %v896_v59, %s1295_s25  ;;  %948 = vrot.lane.b32.xlu1 %v895_v58, %s1295_s25 }
 0x1ae   : > { %773 = vmatpush.bf16.msra.mxu2 %v530_v11  ;;  %792 = vmatpush.bf16.msra.mxu3 %v531_v17 }
 0x1b3   : > { %v516_v23 = vpop.permute.xlu1 %515  ;;  %v520_v24 = vpop.permute.xlu0 %519 }
 0x1b4   : > { %934 = vrot.lane.b32.xlu0 %v493_v53, %s1295_s25  ;;  %v528_v35 = vsel %vm527_vm1, %v516_v23, %v518_v22  ;;  %v529_v36 = vsel %vm527_vm1, %v518_v22, %v520_v24 }
 0x1b5   : > { %944 = vrot.lane.b32.xlu2 %v894_v25, %s1295_s25  ;;  %942 = vrot.lane.b32.xlu1 %v893_v21, %s1295_s25 }
 0x1b6   : > { %774 = vmatpush.bf16.msra.mxu2 %v528_v35  ;;  %793 = vmatpush.bf16.msra.mxu3 %v529_v36  ;;  %v1241_v36 = vld [vmem:[%s1995_s3 + $0x20] sm:$0xff] }
 0x1ba   : > { %775 = vmatpush.bf16.msra.mxu2 %v1850_v16  ;;  %794 = vmatpush.bf16.msra.mxu3 %v1848_v14 }
 0x1bc   : > { %928 = vrot.lane.b32.xlu0 %v1626_v40, %s1295_s25  ;;  %v652_v40 = vpop.permute.xlu2 %651 }
 0x1bd   : > { %926 = vrot.lane.b32.xlu2 %v1644_v46, %s1295_s25  ;;  %924 = vrot.lane.b32.xlu1 %v1652_v47, %s1295_s25  ;;  %v660_v47 = vpop.permute.xlu0 %659 }
 0x1be   : > { %776 = vmatpush.bf16.msra.mxu2 %v501_v33  ;;  %795 = vmatpush.bf16.msra.mxu3 %v502_v32  ;;  %v689_v33 = vsel %vm685_vm2, %v658_v3, %v660_v47 }
 0x1c2   : > { %777 = vmatpush.bf16.msra.mxu2 %v1660_v15  ;;  %796 = vmatpush.bf16.msra.mxu3 %v1668_v48  ;;  %v656_v15 = vpop.permute.xlu1 %655 }
 0x1c3   : > { %v688_v19 = vsel %vm685_vm2, %v656_v15, %v658_v3  ;;  %v1242_v3 = vld [vmem:[%s1995_s3 + $0x28] sm:$0xff] }
 0x1c4   : > { %922 = vrot.lane.b32.xlu0 %v1713_v8, %s1295_s25 }
 0x1c5   : > { %920 = vrot.lane.b32.xlu2 %v1720_v9, %s1295_s25  ;;  %918 = vrot.lane.b32.xlu1 %v1693_v4, %s1295_s25  ;;  %v654_v48 = vpop.permute.xlu0 %653  ;;  %v1237_v9 = vld [vmem:[%s1995_s3] sm:$0xff] }
 0x1c6   : > { %778 = vmatpush.bf16.msra.mxu2 %v1700_v5  ;;  %797 = vmatpush.bf16.msra.mxu3 %v1727_v10  ;;  %v687_v39 = vsel %vm685_vm2, %v652_v40, %v654_v48 }
 0x1c9   : > { %1212 = vmatmul.msk.bf16.vlgmr.msra.gmra.mxu2 %vm710_vm10, %v1237_v9  ;;  %1214 = vmatmul.msk.bf16.vlgmr.msra.gmra.mxu3 %vm710_vm10, %v1237_v9 }
 0x1ca   : > { %v650_v26 = vpop.permute.xlu1 %649 }
 0x1cb   : > { %v686_v43 = vsel %vm685_vm2, %v650_v26, %v652_v40 }
 0x1cd   : > { %v672_v8 = vpop.permute.xlu0 %671 }
 0x1d7   : > { %v670_v46 = vpop.permute.xlu2 %669 }
 0x1d8   : > { %v693_v12 = vsel %vm685_vm2, %v670_v46, %v672_v8 }
 0x1d9   : > { %1213 = vmatmul.msk.bf16.gmra.mxu2 %vm710_vm10, %v1238_v50  ;;  %1215 = vmatmul.msk.bf16.gmra.mxu3 %vm710_vm10, %v1238_v50 }
 0x1df   : > { %v664_v38 = vpop.permute.xlu2 %663 }
 0x1e7   : > { %v682_v27 = vpop.permute.xlu2 %681 }
 0x1ef   : > { %v668_v30 = vpop.permute.xlu1 %667  ;;  %v676_v20 = vpop.permute.xlu2 %675 }
 0x1f0   : > { %v692_v14 = vsel %vm685_vm2, %v668_v30, %v670_v46 }
 0x1f6   : > { %v666_v4 = vpop.permute.xlu0 %665 }
 0x1f7   : > { %v662_v5 = vpop.permute.xlu1 %661  ;;  %v1914_v10 = vpop.permute.xlu2 %938  ;;  %v691_v53 = vsel %vm685_vm2, %v664_v38, %v666_v4 }
 0x1f8   : > { %v690_v32 = vsel %vm685_vm2, %v662_v5, %v664_v38 }
 0x1fe   : > { %v684_v54 = vpop.permute.xlu0 %683 }
 0x1ff   : > { %v680_v28 = vpop.permute.xlu1 %679  ;;  %v697_v29 = vsel %vm685_vm2, %v682_v27, %v684_v54  ;;  %v1918_v56 = vpop.permute.xlu2 %932 }
 0x200   : > { %738 = vmatpush.bf16.msra.mxu1 %v697_v29  ;;  %v696_v55 = vsel %vm685_vm2, %v680_v28, %v682_v27 }
 0x201   : > { %719 = vmatpush.bf16.msra.mxu0 %v696_v55 }
 0x206   : > { %v678_v51 = vpop.permute.xlu0 %677 }
 0x207   : > { %v674_v57 = vpop.permute.xlu1 %673  ;;  %v695_v0 = vsel %vm685_vm2, %v676_v20, %v678_v51  ;;  %v951_v13 = vpop.permute.xlu2 %950 }
 0x208   : > { %739 = vmatpush.bf16.msra.mxu1 %v695_v0  ;;  %v694_v1 = vsel %vm685_vm2, %v674_v57, %v676_v20 }
 0x209   : > { %720 = vmatpush.bf16.msra.mxu0 %v694_v1 }
 0x20c   : > { %740 = vmatpush.bf16.msra.mxu1 %v693_v12 }
 0x20d   : > { %721 = vmatpush.bf16.msra.mxu0 %v692_v14 }
 0x20e   : > { %v953_v16 = vpop.permute.xlu0 %952 }
 0x20f   : > { %v937_v52 = vpop.permute.xlu1 %936  ;;  %v966_v31 = vsel %vm710_vm10, %v951_v13, %v953_v16  ;;  %v945_v18 = vpop.permute.xlu2 %944 }
 0x210   : > { %741 = vmatpush.bf16.msra.mxu1 %v691_v53  ;;  %1249 = vmatpush.bf16.msrb.mxu3 %v966_v31  ;;  %v961_v59 = vsel %vm710_vm10, %v937_v52, %v1914_v10 }
 0x211   : > { %722 = vmatpush.bf16.msra.mxu0 %v690_v32 }
 0x214   : > { %742 = vmatpush.bf16.msra.mxu1 %v689_v33 }
 0x215   : > { %723 = vmatpush.bf16.msra.mxu0 %v688_v19 }
 0x216   : > { %v947_v34 = vpop.permute.xlu0 %946 }
 0x217   : > { %v931_v37 = vpop.permute.xlu1 %930  ;;  %v964_v41 = vsel %vm710_vm10, %v945_v18, %v947_v34  ;;  %v927_v7 = vpop.permute.xlu2 %926 }
 0x218   : > { %743 = vmatpush.bf16.msra.mxu1 %v687_v39  ;;  %1250 = vmatpush.bf16.msrb.mxu3 %v964_v41  ;;  %v959_v22 = vsel %vm710_vm10, %v931_v37, %v1918_v56 }
 0x219   : > { %724 = vmatpush.bf16.msra.mxu0 %v686_v43 }
 0x21b   : > { %1202 = vmatmul.msk.bf16.vlgmr.msra.gmra.mxu1 %vm710_vm10, %v1239_v42 }
 0x21c   : > { %1006 = vmatpush.bf16.msrb.mxu1 %v966_v31  ;;  %1200 = vmatmul.msk.bf16.vlgmr.msra.gmra.mxu0 %vm710_vm10, %v1239_v42 }
 0x21e   : > { %v941_v44 = vpop.permute.xlu0 %940 }
 0x21f   : > { %v949_v45 = vpop.permute.xlu1 %948  ;;  %v962_v49 = vsel %vm710_vm10, %v1914_v10, %v941_v44  ;;  %v921_v24 = vpop.permute.xlu2 %920 }
 0x220   : > { %1007 = vmatpush.bf16.msrb.mxu1 %v964_v41  ;;  %1251 = vmatpush.bf16.msrb.mxu3 %v962_v49  ;;  %v965_v60 = vsel %vm710_vm10, %v949_v45, %v951_v13 }
 0x221   : > { %987 = vmatpush.bf16.msrb.mxu0 %v965_v60  ;;  %1243 = vmatpush.bf16.msrb.mxu2 %v965_v60 }
 0x224   : > { %1008 = vmatpush.bf16.msrb.mxu1 %v962_v49 }
 0x226   : > { %v935_v61 = vpop.permute.xlu0 %934 }
 0x227   : > { %v943_v62 = vpop.permute.xlu1 %942  ;;  %v960_v63 = vsel %vm710_vm10, %v1918_v56, %v935_v61 }
 0x228   : > { %1009 = vmatpush.bf16.msrb.mxu1 %v960_v63  ;;  %1252 = vmatpush.bf16.msrb.mxu3 %v960_v63  ;;  %v963_v6 = vsel %vm710_vm10, %v943_v62, %v945_v18 }
 0x229   : > { %988 = vmatpush.bf16.msrb.mxu0 %v963_v6  ;;  %1244 = vmatpush.bf16.msrb.mxu2 %v963_v6 }
 0x22b   : > { %1203 = vmatmul.msk.bf16.gmra.mxu1 %vm710_vm10, %v1240_v2 }
 0x22c   : > { %1201 = vmatmul.msk.bf16.gmra.mxu0 %vm710_vm10, %v1240_v2 }
 0x22d   : > { %989 = vmatpush.bf16.msrb.mxu0 %v961_v59  ;;  %1245 = vmatpush.bf16.msrb.mxu2 %v961_v59 }
 0x22e   : > { %v929_v58 = vpop.permute.xlu0 %928 }
 0x22f   : > { %v925_v11 = vpop.permute.xlu1 %924  ;;  %v958_v17 = vsel %vm710_vm10, %v927_v7, %v929_v58 }
 0x230   : > { %1010 = vmatpush.bf16.msrb.mxu1 %v958_v17  ;;  %1253 = vmatpush.bf16.msrb.mxu3 %v958_v17  ;;  %v957_v23 = vsel %vm710_vm10, %v925_v11, %v927_v7 }
 0x231   : > { %990 = vmatpush.bf16.msrb.mxu0 %v959_v22  ;;  %1246 = vmatpush.bf16.msrb.mxu2 %v959_v22 }
 0x235   : > { %991 = vmatpush.bf16.msrb.mxu0 %v957_v23  ;;  %1247 = vmatpush.bf16.msrb.mxu2 %v957_v23 }
 0x236   : > { %v923_v25 = vpop.permute.xlu0 %922 }
 0x237   : > { %v919_v21 = vpop.permute.xlu1 %918  ;;  %v956_v35 = vsel %vm710_vm10, %v921_v24, %v923_v25 }
 0x238   : > { %1011 = vmatpush.bf16.msrb.mxu1 %v956_v35  ;;  %1254 = vmatpush.bf16.msrb.mxu3 %v956_v35  ;;  %v955_v40 = vsel %vm710_vm10, %v919_v21, %v921_v24 }
 0x239   : > { %992 = vmatpush.bf16.msrb.mxu0 %v955_v40  ;;  %1248 = vmatpush.bf16.msrb.mxu2 %v955_v40 }
 0x23b   : > { %1230 = vmatmul.msk.bf16.vlgmr.msrb.gmra.mxu1 %vm710_vm10, %v1241_v36  ;;  %1231 = vmatmul.msk.bf16.vlgmr.msrb.gmra.mxu3 %vm710_vm10, %v1242_v3 }
 0x23c   : > { %1228 = vmatmul.msk.bf16.vlgmr.msrb.gmra.mxu0 %vm710_vm10, %v1241_v36  ;;  %1229 = vmatmul.msk.bf16.vlgmr.msrb.gmra.mxu2 %vm710_vm10, %v1242_v3 }
 0x24c   : > { %v799_v47 = vpop.f32.mrf.mxu3  ;;  %v780_v38 = vpop.f32.mrf.mxu2 }
 0x254   : > { %v801_v27 = vpop.f32.mrf.mxu3  ;;  %v782_v8 = vpop.f32.mrf.mxu2 }
 0x25c   : > { %v804_v9 = vpop.f32.mrf.mxu3  ;;  %v785_v4 = vpop.f32.mrf.mxu2 }
 0x264   : > { %v806_v54 = vpop.f32.mrf.mxu3  ;;  %v787_v29 = vpop.f32.mrf.mxu2 }
 0x298   : > { %v745_v46 = vpop.f32.mrf.mxu1 }
 0x299   : > { %v726_v15 = vpop.f32.mrf.mxu0  ;;  %v800_v28 = vadd.f32 %v799_v47, %v745_v46 }
 0x29a   : > { %v781_v55 = vadd.f32 %v780_v38, %v726_v15 }
 0x2a0   : > { %v747_v48 = vpop.f32.mrf.mxu1 }
 0x2a1   : > { %v728_v26 = vpop.f32.mrf.mxu0  ;;  %v802_v16 = vadd.f32 %v801_v27, %v747_v48 }
 0x2a2   : > { %v783_v31 = vadd.f32 %v782_v8, %v728_v26 }
 0x2a8   : > { %v750_v30 = vpop.f32.mrf.mxu1 }
 0x2a9   : > { %v731_v20 = vpop.f32.mrf.mxu0  ;;  %v805_v12 = vadd.f32 %v804_v9, %v750_v30 }
 0x2aa   : > { %v786_v13 = vadd.f32 %v785_v4, %v731_v20 }
 0x2b0   : > { %v752_v5 = vpop.f32.mrf.mxu1 }
 0x2b1   : > { %v733_v10 = vpop.f32.mrf.mxu0  ;;  %v807_v45 = vadd.f32 %v806_v54, %v752_v5 }
 0x2b2   : > { %v788_v49 = vadd.f32 %v787_v29, %v733_v10 }
 0x2b8   : > { %v1013_v56 = vpop.f32.mrf.mxu1 }
 0x2b9   : > { %v1024_v50 = vadd.f32 %v1013_v56, %v800_v28  ;;  %v994_v51 = vpop.f32.mrf.mxu0 }
 0x2ba   : > { %v1023_v57 = vadd.f32 %v994_v51, %v781_v55 }
 0x2bb   : > { %v1060_v18 = vmul.f32 %v1024_v50, %v1024_v50 }
 0x2bc   : > { %v1039_v0 = vpack.c.bf16 %v1024_v50, %v1023_v57  ;;  %v1047_v1 = vadd.f32 %v1024_v50, %v1023_v57  ;;  %v1059_v19 = vmul.f32 %v1023_v57, %v1023_v57 }
 0x2be   : > { %1043 = vst [vmem:[%s1975_s15] sm:$0xff] %v1039_v0  ;;  %v1018_v14 = vpop.f32.mrf.mxu3  ;;  %1048 = vadd.xlane.f32.xlu1 %v1047_v1  ;;  %v1067_v44 = vadd.f32 %v1060_v18, %v1059_v19 }
 0x2bf   : > { %v1028_v52 = vadd.f32 %v1018_v14, %v805_v12  ;;  %v999_v53 = vpop.f32.mrf.mxu2 }
 0x2c0   : > { %v1027_v32 = vadd.f32 %v999_v53, %v786_v13  ;;  %v1015_v33 = vpop.f32.mrf.mxu1 }
 0x2c1   : > { %v1026_v34 = vadd.f32 %v1015_v33, %v802_v16  ;;  %v996_v37 = vpop.f32.mrf.mxu0  ;;  %v1064_v62 = vmul.f32 %v1028_v52, %v1028_v52 }
 0x2c2   : > { %v1041_v39 = vpack.c.bf16 %v1028_v52, %v1027_v32  ;;  %v1025_v41 = vadd.f32 %v996_v37, %v783_v31  ;;  %v1053_v42 = vadd.f32 %v1028_v52, %v1027_v32  ;;  %v1063_v61 = vmul.f32 %v1027_v32, %v1027_v32 }
 0x2c3   : > { %v1062_v25 = vmul.f32 %v1026_v34, %v1026_v34 }
 0x2c4   : > { %1045 = vst [vmem:[%s1975_s15 + $0x10] sm:$0xff] %v1041_v39  ;;  %v1040_v43 = vpack.c.bf16 %v1026_v34, %v1025_v41  ;;  %1054 = vadd.xlane.f32.xlu0 %v1053_v42  ;;  %v1073_v58 = vadd.f32 %v1064_v62, %v1063_v61  ;;  %v1050_v23 = vadd.f32 %v1026_v34, %v1025_v41 }
 0x2c5   : > { %v1061_v24 = vmul.f32 %v1025_v41, %v1025_v41 }
 0x2c6   : > { %1044 = vst [vmem:[%s1975_s15 + $0x8] sm:$0xff] %v1040_v43  ;;  %v1020_v60 = vpop.f32.mrf.mxu3  ;;  %1068 = vadd.xlane.f32.xlu1 %v1067_v44 }
 0x2c7   : > { %v1030_v63 = vadd.f32 %v1020_v60, %v807_v45  ;;  %v1001_v2 = vpop.f32.mrf.mxu2  ;;  %v1070_v21 = vadd.f32 %v1062_v25, %v1061_v24 }
 0x2c8   : > { %v1029_v6 = vadd.f32 %v1001_v2, %v788_v49 }
 0x2c9   : > { %v1066_v7 = vmul.f32 %v1030_v63, %v1030_v63 }
 0x2ca   : > { %v1042_v59 = vpack.c.bf16 %v1030_v63, %v1029_v6  ;;  %v1056_v11 = vadd.f32 %v1030_v63, %v1029_v6  ;;  %v1065_v17 = vmul.f32 %v1029_v6, %v1029_v6 }
 0x2cc   : > { %1046 = vst [vmem:[%s1975_s15 + $0x18] sm:$0xff] %v1042_v59  ;;  %1074 = vadd.xlane.f32.xlu0 %v1073_v58  ;;  %1057 = vadd.xlane.f32.xlu2 %v1056_v11  ;;  %v1076_v22 = vadd.f32 %v1066_v7, %v1065_v17 }
 0x2ce   : > { %1077 = vadd.xlane.f32.xlu1 %v1076_v22 }
 0x2d4   : > { %1051 = vadd.xlane.f32.xlu2 %v1050_v23 }
 0x2dc   : > { %1071 = vadd.xlane.f32.xlu2 %v1070_v21 }
 0x331   : > { %v1049_v35 = vpop.xlane.xlu1 %1048 }
 0x337   : > { %v1055_v36 = vpop.xlane.xlu0 %1054 }
 0x339   : > { %v1069_v3 = vpop.xlane.xlu1 %1068 }
 0x33a   : > { %v1080_v40 = vsel %vm1079_vm0, %v1049_v35, %v1069_v3 }
 0x33b   : > { %1085 = vst.msk [vmem:[%s237_s21] sm:$0xff] %vm2149_vm5, %v1080_v40 }
 0x33f   : > { %v1075_v46 = vpop.xlane.xlu0 %1074  ;;  %v1058_v47 = vpop.xlane.xlu2 %1057 }
 0x340   : > { %v1082_v15 = vsel %vm1079_vm0, %v1055_v36, %v1075_v46 }
 0x341   : > { %1087 = vst.msk [vmem:[%s237_s21 + $0x10] sm:$0xff] %vm2150_vm9, %v1082_v15  ;;  %v1078_v38 = vpop.xlane.xlu1 %1077 }
 0x342   : > { %v1083_v48 = vsel %vm1079_vm0, %v1058_v47, %v1078_v38 }
 0x343   : > { %1088 = vst.msk [vmem:[%s237_s21 + $0x18] sm:$0xff] %vm2151_vm12, %v1083_v48 }
 0x347   : > { %v1052_v26 = vpop.xlane.xlu2 %1051 }
 0x34f   : > { %v1072_v27 = vpop.xlane.xlu2 %1071 }
 0x350   : > { %v1081_v8 = vsel %vm1079_vm0, %v1052_v26, %v1072_v27 }
 0x351   : > { %1086 = vst.msk [vmem:[%s237_s21 + $0x8] sm:$0xff] %vm2152_vm15, %v1081_v8 }
 0x352 PF: > { %s16_s18 = sadd.s32 1, %s1283_s18  }
 0x353   : > { %p13_p4 = scmp.ge.s32.totalorder %s16_s18, 4  }
 0x355   :  { %15 = sbr.rel (!%p13_p4) target bundleno = 1 (0x1), region = 80 }

</bundles_post_ra>
